<compile_context>
chip_gen: v7x
topology: tpu7x:2x2x1
jax: 0.10.0
libtpu: 0.0.40
codegen_flags: <defaults>
</compile_context>

<pallas_src>
import jax
import jax.numpy as jnp
from jax.experimental import pallas as pl
from jax.experimental.pallas import tpu as pltpu


_TARGET_BLOCK_BYTES = 2 * 1024 * 1024     # ~2 MiB/plane block: past the HBM-roofline knee
_PIPELINE_VMEM_BUDGET = 24 * 1024 * 1024  # 4 planes x 2 pipeline buffers; v7x (64 MiB VMEM) safe
_MIN_GRID_STEPS = 8                       # keep enough grid steps for v7x's 2 TensorCores


def _crystal_kernel(coeff_ref, re_ref, im_ref, out_re_ref, out_im_ref):
    coeff = coeff_ref[0]                  # gamma * distance (SMEM scalar read is free)
    a = re_ref[...]
    b = im_ref[...]
    # local intensity * gamma * distance -> phase delay
    phi = (a * a + b * b) * coeff
    c = jnp.cos(phi)                      # transcendental (EUP) path
    s = jnp.sin(phi)
    # (a + i b) * (cos(phi) - i sin(phi))
    out_re_ref[...] = a * c + b * s
    out_im_ref[...] = b * c - a * s


def _pick_tile_rows(M, N):
    """Largest sublane tile that fits the pipeline VMEM budget, keeps blocks
    near the HBM-roofline knee, and leaves >= _MIN_GRID_STEPS grid steps."""
    if M <= 8:
        return M
    bytes_per_row = 4 * N
    # 4 plane blocks (re, im, out_re, out_im) x 2 pipeline buffers each.
    max_rows = max(8, (_PIPELINE_VMEM_BUDGET // (8 * bytes_per_row)) // 8 * 8)
    target_rows = max(8, (_TARGET_BLOCK_BYTES // bytes_per_row) // 8 * 8)
    tile = min(max_rows, target_rows)
    if M >= _MIN_GRID_STEPS * 8:
        # Don't let a huge tile collapse the grid to 1-2 steps (megacore sharding).
        tile = min(tile, max(8, (M // _MIN_GRID_STEPS) // 8 * 8))
    if tile >= M:
        return M                          # single full block (block == array is always legal)
    return max(8, (tile // 8) * 8)        # sublane-aligned tiling; last block may be partial


def sb_crystal_update(field, gamma, distance):
    """Pallas implementation of SB_Crystal_Update.forward for a 2-D complex field."""
    assert field.ndim == 2, "kernel wrapper handles the MxN (2-D) field case"
    M, N = field.shape

    re = jnp.real(field).astype(jnp.float32)
    im = jnp.imag(field).astype(jnp.float32)
    coeff = (jnp.asarray(gamma, dtype=jnp.float32)
             * jnp.asarray(distance, dtype=jnp.float32)).reshape((1,))

    tile_rows = _pick_tile_rows(M, N)
    grid = (pl.cdiv(M, tile_rows),)
    plane_spec = pl.BlockSpec((tile_rows, N), lambda i: (i, 0))
    smem_spec = pl.BlockSpec(memory_space=pltpu.MemorySpace.SMEM)

    # Double-buffered VMEM footprint of the 4 plane blocks, plus headroom.
    vmem_needed = 8 * tile_rows * N * 4
    vmem_limit = int(vmem_needed + (4 << 20))

    out_re, out_im = pl.pallas_call(
        _crystal_kernel,
        out_shape=(
            jax.ShapeDtypeStruct((M, N), jnp.float32),
            jax.ShapeDtypeStruct((M, N), jnp.float32),
        ),
        grid_spec=pltpu.PrefetchScalarGridSpec(
            num_scalar_prefetch=0,
            grid=grid,
            in_specs=[smem_spec, plane_spec, plane_spec],
            out_specs=[plane_spec, plane_spec],
        ),
        compiler_params=pltpu.CompilerParams(
            dimension_semantics=("parallel",),
            vmem_limit_bytes=vmem_limit,
            # Allow XLA to fuse the real/imag extraction into the kernel inputs
            # instead of materializing two extra f32 planes in HBM.
            allow_input_fusion=[False, True, True],
        ),
        cost_estimate=pl.CostEstimate(
            flops=7 * M * N,
            transcendentals=2 * M * N,
            bytes_accessed=16 * M * N,
        ),
    )(coeff, re, im)

    eout = jax.lax.complex(out_re, out_im)
    # PyTorch: if field.ndim == 2 -> Eout.squeeze()  (no-op unless size-1 dims)
    return jnp.squeeze(eout)


def _reference(field, gamma, distance):
    return field * jnp.exp(-1j * jnp.abs(field) ** 2 * gamma * distance)


if __name__ == "__main__":
    key = jax.random.PRNGKey(0)
    k1, k2 = jax.random.split(key)

    # Small 2-D optical field; N is a multiple of 128 (lane-dense stores).
    M, N = 256, 256
    re = jax.random.normal(k1, (M, N), dtype=jnp.float32)
    im = jax.random.normal(k2, (M, N), dtype=jnp.float32)
    field = jax.lax.complex(re, im)  # complex64 field (M x N)

    gamma = 0.7
    distance = 0.05

    fwd = jax.jit(sb_crystal_update)
    out = jax.block_until_ready(fwd(field, gamma, distance))

    ref = _reference(field.astype(jnp.complex64), gamma, distance)
    assert out.shape == ref.shape
    assert out.dtype == jnp.complex64
    max_err = float(jnp.max(jnp.abs(out - ref)))
    assert max_err < 1e-4, f"max abs error {max_err}"

    print("KERNEL_OK")
</pallas_src>

<mosaic_0001>
module attributes {stable_mosaic.version = 11 : i64} {
  func.func @_crystal_kernel(%arg0: i32, %arg1: memref<1xf32, #tpu.memory_space<smem>>, %arg2: memref<32x256xf32, #tpu.memory_space<vmem>>, %arg3: memref<32x256xf32, #tpu.memory_space<vmem>>, %arg4: memref<32x256xf32, #tpu.memory_space<vmem>>, %arg5: memref<32x256xf32, #tpu.memory_space<vmem>>) attributes {dimension_semantics = [#tpu.dimension_semantics<parallel>], iteration_bounds = array<i64: 8>, scalar_prefetch = 0 : i64, scratch_operands = 0 : i64, tpu.core_type = #tpu.core_type<tc>, window_params = [{transform_indices = @transform_0, window_bounds = array<i64: 1>}, {transform_indices = @transform_1, window_bounds = array<i64: 32, 256>}, {transform_indices = @transform_2, window_bounds = array<i64: 32, 256>}, {transform_indices = @transform_3, window_bounds = array<i64: 32, 256>}, {transform_indices = @transform_4, window_bounds = array<i64: 32, 256>}]} {
    %c0 = arith.constant 0 : index
    %0 = memref.load %arg1[%c0] : memref<1xf32, #tpu.memory_space<smem>>
    %c0_0 = arith.constant 0 : index
    %c0_1 = arith.constant 0 : index
    %1 = vector.load %arg2[%c0_0, %c0_1] : memref<32x256xf32, #tpu.memory_space<vmem>>, vector<32x256xf32>
    %c0_2 = arith.constant 0 : index
    %c0_3 = arith.constant 0 : index
    %2 = vector.load %arg3[%c0_2, %c0_3] : memref<32x256xf32, #tpu.memory_space<vmem>>, vector<32x256xf32>
    %3 = arith.mulf %1, %1 : vector<32x256xf32>
    %4 = arith.mulf %2, %2 : vector<32x256xf32>
    %5 = arith.addf %3, %4 : vector<32x256xf32>
    %6 = vector.broadcast %0 : f32 to vector<32x256xf32>
    %7 = arith.mulf %5, %6 : vector<32x256xf32>
    %8 = math.cos %7 : vector<32x256xf32>
    %9 = math.sin %7 : vector<32x256xf32>
    %10 = arith.mulf %1, %8 : vector<32x256xf32>
    %11 = arith.mulf %2, %9 : vector<32x256xf32>
    %12 = arith.addf %10, %11 : vector<32x256xf32>
    %c0_4 = arith.constant 0 : index
    %c0_5 = arith.constant 0 : index
    %13 = vector.load %arg4[%c0_4, %c0_5] : memref<32x256xf32, #tpu.memory_space<vmem>>, vector<32x256xf32>
    tpu.vector_store %arg4[%c0_4, %c0_5], %12 {strides = array<i32>} : memref<32x256xf32, #tpu.memory_space<vmem>>, vector<32x256xf32>,
    %14 = arith.mulf %2, %8 : vector<32x256xf32>
    %15 = arith.mulf %1, %9 : vector<32x256xf32>
    %16 = arith.subf %14, %15 : vector<32x256xf32>
    %c0_6 = arith.constant 0 : index
    %c0_7 = arith.constant 0 : index
    %17 = vector.load %arg5[%c0_6, %c0_7] : memref<32x256xf32, #tpu.memory_space<vmem>>, vector<32x256xf32>
    tpu.vector_store %arg5[%c0_6, %c0_7], %16 {strides = array<i32>} : memref<32x256xf32, #tpu.memory_space<vmem>>, vector<32x256xf32>,
    return
  }
  func.func @transform_0(%arg0: i32) -> i32 {
    %c0_i32 = arith.constant 0 : i32
    %c0_i32_0 = arith.constant 0 : i32
    return %c0_i32 : i32
  }
  func.func @transform_1(%arg0: i32) -> (i32, i32) {
    %c0_i32 = arith.constant 0 : i32
    %c0_i32_0 = arith.constant 0 : i32
    return %arg0, %c0_i32 : i32, i32
  }
  func.func @transform_2(%arg0: i32) -> (i32, i32) {
    %c0_i32 = arith.constant 0 : i32
    %c0_i32_0 = arith.constant 0 : i32
    return %arg0, %c0_i32 : i32, i32
  }
  func.func @transform_3(%arg0: i32) -> (i32, i32) {
    %c0_i32 = arith.constant 0 : i32
    %c0_i32_0 = arith.constant 0 : i32
    return %arg0, %c0_i32 : i32, i32
  }
  func.func @transform_4(%arg0: i32) -> (i32, i32) {
    %c0_i32 = arith.constant 0 : i32
    %c0_i32_0 = arith.constant 0 : i32
    return %arg0, %c0_i32 : i32, i32
  }
}

</mosaic_0001>

<bundles_post_ra>
// kernel: custom-call
= control target key start
LH: loop header
LB: loop body
LE: loop exit
PB: predicated region body
PF: predicated region fallthrough
CT: control target
= control target key end

     0   :  { %2 = vsyncpa [#allocation0], 0  ;;  %s61_s0 = inlined_call_operand.hbm [shape: c64[256,256], index: 0, kind: input, shape index: {}]   ;;  %s62_s1 = inlined_call_operand.vmem [shape: f32[256,256], index: 1, kind: output, shape index: {}]  }
   0x1   :  { %s3_s8 = sshll.u32 %s62_s1, 4  ;;  %s9_s11 = scalar_lea.hbm %s61_s0, 8192  ;;  %s4_s8 = int_to_ptr.vmem [resolvable:$true] %s3_s8 }
   0x2   :  { %p10_p0 = scmp.ne.s32.totalorder %s61_s0, %s9_s11  ;;  %s11_s16 = scalar_lea.hbm %s61_s0, 16384 }
   0x3   :  { %p12_p1 = scmp.lt.u32.totalorder %s11_s16, %s9_s11  ;;  %p13_p2 = scmp.lt.u32.totalorder %s9_s11, %s61_s0 }
   0x5   :  { %p14_p3 = por %p13_p2, %p12_p1 }
   0x7   :  { %p15_p4 = pnand %p14_p3, %p10_p0 }
   0x9   :  { %18 = shalt.err (!%p15_p4)  }
   0xa   :  { %s19_s1 = scalar_lea.vmem %s4_s8, 8192  ;;  %p24_p6 = scmp.lt.s32.totalorder %s4_s8, %s4_s8 }
   0xb   :  { %p20_p5 = scmp.ne.s32.totalorder %s4_s8, %s19_s1  ;;  %p25_p7 = scmp.lt.s32.totalorder %s19_s1, %s19_s1 }
   0xd   :  { %p26_p8 = por %p25_p7, %p24_p6 }
   0xf   :  { %p27_p9 = pnand %p26_p8, %p20_p5 }
  0x11   :  { %30 = shalt.err (!%p27_p9)  }
  0x12   :  { %6 = dma.hbm_to_vmem [thread:$0]  %s61_s0, 8192, %s4_s8, [#allocation0] }
  0x13   :  { %31 = dma.done.wait [#allocation0], 8192  }
  0x14   :  { %32 = vsyncadd [#allocation0], 4294959104 }
  0x15   :  { %8 = vsyncpa [#allocation0], 1 }

// kernel: custom-call.2
= control target key start
LH: loop header
LB: loop body
LE: loop exit
PB: predicated region body
PF: predicated region fallthrough
CT: control target
= control target key end

     0   :  { %s126_s0 = inlined_call_operand.vmem [shape: f32[256,256], index: 0, kind: input, shape index: {}]   ;;  %s127_s1 = inlined_call_operand.vmem [shape: f32[256,256], index: 1, kind: input, shape index: {}]   ;;  %s128_s2 = inlined_call_operand.hbm [shape: c64[256,256], index: 2, kind: output, shape index: {}]  }
   0x1   :  { %s87_s11 = scalar_lea.hbm %s128_s2, 8192 }
   0x2   :  { %4 = vsyncpa [#allocation0], 0  ;;  %s5_s14 = sshll.u32 %s126_s0, 4  ;;  %s6_s14 = int_to_ptr.vmem [resolvable:$true] %s5_s14 }
   0x3   :  { %s18_s15 = scalar_lea.vmem %s6_s14, 8192  ;;  %p23_p1 = scmp.lt.s32.totalorder %s6_s14, %s6_s14 }
   0x4   :  { %p19_p0 = scmp.ne.s32.totalorder %s6_s14, %s18_s15  ;;  %p24_p2 = scmp.lt.s32.totalorder %s18_s15, %s18_s15 }
   0x6   :  { %p25_p3 = por %p24_p2, %p23_p1 }
   0x8   :  { %p26_p4 = pnand %p25_p3, %p19_p0 }
   0xa   :  { %29 = shalt.err (!%p26_p4)  }
   0xb   :  { %p31_p5 = scmp.ne.s32.totalorder %s128_s2, %s87_s11  ;;  %s32_s0 = scalar_lea.hbm %s128_s2, 16384 }
   0xc   :  { %p33_p6 = scmp.lt.u32.totalorder %s32_s0, %s87_s11  ;;  %p34_p7 = scmp.lt.u32.totalorder %s87_s11, %s128_s2 }
   0xe   :  { %p35_p8 = por %p34_p7, %p33_p6 }
  0x10   :  { %p36_p9 = pnand %p35_p8, %p31_p5 }
  0x12   :  { %39 = shalt.err (!%p36_p9)  }
  0x13   :  { %8 = dma.vmem_to_hbm [thread:$0]  %s6_s14, 8192, %s128_s2, [#allocation0] }
  0x14   :  { %65 = dma.done.wait [#allocation0], 8192  }
  0x15   :  { %66 = vsyncadd [#allocation0], 4294959104 }
  0x16   :  { %10 = vsyncpa [#allocation0], 1 }
  0x17   :  { %11 = vsyncpa [#allocation1], 0  ;;  %s12_s28 = sshll.u32 %s127_s1, 4  ;;  %s13_s28 = int_to_ptr.vmem [resolvable:$true] %s12_s28 }
  0x18   :  { %s40_s29 = scalar_lea.vmem %s13_s28, 8192  ;;  %p45_p11 = scmp.lt.s32.totalorder %s13_s28, %s13_s28 }
  0x19   :  { %p41_p10 = scmp.ne.s32.totalorder %s13_s28, %s40_s29  ;;  %p46_p12 = scmp.lt.s32.totalorder %s40_s29, %s40_s29 }
  0x1b   :  { %p47_p13 = por %p46_p12, %p45_p11 }
  0x1d   :  { %p48_p0 = pnand %p47_p13, %p41_p10 }
  0x1f   :  { %51 = shalt.err (!%p48_p0)  }
  0x20   :  { %p53_p1 = scmp.ne.s32.totalorder %s87_s11, %s32_s0  ;;  %p56_p2 = scmp.lt.u32.totalorder %s32_s0, %s32_s0 }
  0x22   :  { %p57_p3 = por %p56_p2, %p34_p7 }
  0x24   :  { %p59_p4 = por %p57_p3, %p33_p6 }
  0x26   :  { %p60_p5 = pnand %p59_p4, %p53_p1 }
  0x28   :  { %63 = shalt.err (!%p60_p5)  }
  0x29   :  { %15 = dma.vmem_to_hbm [thread:$0]  %s13_s28, 8192, %s87_s11, [#allocation1] }
  0x2a   :  { %67 = dma.done.wait [#allocation1], 8192  }
  0x2b   :  { %68 = vsyncadd [#allocation1], 4294959104 }
  0x2c   :  { %17 = vsyncpa [#allocation1], 1 }

// kernel: custom-call.1
= control target key start
LH: loop header
LB: loop body
LE: loop exit
PB: predicated region body
PF: predicated region fallthrough
CT: control target
= control target key end

     0   :  { %s59_s0 = inlined_call_operand.hbm [shape: c64[256,256], index: 0, kind: input, shape index: {}]   ;;  %s60_s1 = inlined_call_operand.vmem [shape: f32[256,256], index: 1, kind: output, shape index: {}]  }
   0x1   :  { %s2_s8 = scalar_lea.hbm %s59_s0, 8192 }
   0x2   :  { %3 = vsyncpa [#allocation0], 0  ;;  %s4_s11 = sshll.u32 %s60_s1, 4  ;;  %s34_s14 = scalar_lea.hbm %s59_s0, 16384  ;;  %s5_s11 = int_to_ptr.vmem [resolvable:$true] %s4_s11 }
   0x3   :  { %p11_p0 = scmp.ne.s32.totalorder %s2_s8, %s34_s14  ;;  %p13_p1 = scmp.lt.u32.totalorder %s2_s8, %s59_s0 }
   0x4   :  { %p14_p2 = scmp.lt.u32.totalorder %s34_s14, %s34_s14  ;;  %p16_p4 = scmp.lt.u32.totalorder %s34_s14, %s2_s8 }
   0x6   :  { %p15_p3 = por %p14_p2, %p13_p1 }
   0x8   :  { %p17_p5 = por %p16_p4, %p15_p3 }
   0xa   :  { %p18_p6 = pnand %p17_p5, %p11_p0 }
   0xc   :  { %21 = shalt.err (!%p18_p6)  }
   0xd   :  { %s22_s17 = scalar_lea.vmem %s5_s11, 8192  ;;  %p27_p8 = scmp.lt.s32.totalorder %s5_s11, %s5_s11 }
   0xe   :  { %p23_p7 = scmp.ne.s32.totalorder %s5_s11, %s22_s17  ;;  %p28_p9 = scmp.lt.s32.totalorder %s22_s17, %s22_s17 }
  0x10   :  { %p29_p10 = por %p28_p9, %p27_p8 }
  0x12   :  { %p30_p11 = pnand %p29_p10, %p23_p7 }
  0x14   :  { %33 = shalt.err (!%p30_p11)  }
  0x15   :  { %7 = dma.hbm_to_vmem [thread:$0]  %s2_s8, 8192, %s5_s11, [#allocation0] }
  0x16   :  { %35 = dma.done.wait [#allocation0], 8192  }
  0x17   :  { %36 = vsyncadd [#allocation0], 4294959104 }
  0x18   :  { %9 = vsyncpa [#allocation0], 1 }

// kernel: sb_crystal_update.1
= control target key start
LH: loop header
LB: loop body
LE: loop exit
PB: predicated region body
PF: predicated region fallthrough
CT: control target
= control target key end

     0   :  { %s2345_s17 = smov 0   ;;  %s3329_s0 = inlined_call_operand.<no memory space> [shape: f32[1], index: 0, kind: input, shape index: {}]   ;;  %s3330_s1 = inlined_call_operand.vmem [shape: f32[256,256], index: 1, kind: input, shape index: {}]   ;;  %s3331_s2 = inlined_call_operand.vmem [shape: f32[256,256], index: 2, kind: input, shape index: {}]   ;;  %s3332_s3 = inlined_call_operand.vmem [shape: f32[256,256], index: 3, kind: output, shape index: {0}]   ;;  %s3333_s4 = inlined_call_operand.vmem [shape: f32[256,256], index: 4, kind: output, shape index: {1}]  }
   0x1   :  { %10 = sst [smem:[#allocation2]] %s3329_s0 }
   0x2 LB: > { %s2124_s18 = sadd.s32 4294967295, %s2309_s17   ;;  %p2128_p0 = scmp.ge.s32.totalorder %s2309_s17, 1  ;;  %s2309_s17 = sphi %s2345_s17, %s16_s17  }
   0x3   : > { %p180_p1 = scmp.lt.s32.totalorder %s2309_s17, 9 }
   0x5   : > { %p181_p2 = pnand %p2128_p0, %p180_p1 }
   0x6   : > { %s2129_s19 = sshll.u32 (!%p181_p2), %s2124_s18, 2  ;;  %s248_s20 = sld [smem:[#allocation2]] (!%p181_p2)  ;;  %v2311_v51 = vmov (!%p181_p2), 683565275   ;;  %v2312_v53 = vmov (!%p181_p2), 2475754826  }
   0x7   : > { %184 = sbr.rel (%p181_p2) target bundleno = 294 (0x126), region = 32  ;;  %p221_p3 = scmp.lt.s32.totalorder (!%p181_p2), %s2129_s19, 31  ;;  %v2313_v55 = vmov (!%p181_p2), 2131351028   ;;  %v2314_v57 = vmov (!%p181_p2), 2102212464  }
   0x8   : > { %v2315_v59 = vmov (!%p181_p2), 920167782  }
   0xc   : > { %v2391_v9 = vstv (!%p181_p2), %s248_s20 }
   0xe   : > { %s3349_s19 = smov (!%p221_p3, %s2129_s19), 31 }
   0xf   : > { %s2353_s0 = sshll.u32 %s3349_s19, 4 }
  0x10   : > { %s2359_s23 = scalar_lea.vmem %s3330_s1, %s2353_s0  ;;  %s2365_s26 = scalar_lea.vmem %s3331_s2, %s2353_s0 }
  0x11   : > { %v2368_v0 = vld [vmem:[%s2359_s23] sm:$0xff]  ;;  %v2374_v2 = vld [vmem:[%s2359_s23 + $0x8] sm:$0xff]  ;;  %v2386_v7 = vld [vmem:[%s2359_s23 + $0x10] sm:$0xff]  ;;  %s2733_s29 = scalar_lea.vmem %s3332_s3, %s2353_s0  ;;  %s3130_s6 = scalar_lea.vmem %s3333_s4, %s2353_s0 }
  0x12   : > { %v2371_v1 = vld [vmem:[%s2365_s26] sm:$0xff]  ;;  %v265_v3 = vmul.f32 %v2368_v0, %v2368_v0  ;;  %v2381_v5 = vld [vmem:[%s2365_s26 + $0x8] sm:$0xff]  ;;  %v266_v6 = vmul.f32 %v2374_v2, %v2374_v2  ;;  %v2389_v8 = vld [vmem:[%s2365_s26 + $0x10] sm:$0xff]  ;;  %v267_v11 = vmul.f32 %v2386_v7, %v2386_v7 }
  0x13   : > { %v273_v4 = vmul.f32 %v2371_v1, %v2371_v1  ;;  %v274_v10 = vmul.f32 %v2381_v5, %v2381_v5  ;;  %v275_v12 = vmul.f32 %v2389_v8, %v2389_v8  ;;  %v252_v24 = vld [vmem:[%s2359_s23 + $0x18] sm:$0xff] }
  0x14   : > { %v260_v25 = vld [vmem:[%s2365_s26 + $0x18] sm:$0xff]  ;;  %v268_v33 = vmul.f32 %v252_v24, %v252_v24 }
  0x15   : > { %v281_v13 = vadd.f32 %v273_v4, %v265_v3  ;;  %v282_v14 = vadd.f32 %v274_v10, %v266_v6  ;;  %v283_v15 = vadd.f32 %v275_v12, %v267_v11  ;;  %v276_v34 = vmul.f32 %v260_v25, %v260_v25 }
  0x16   : > { %v2316_v10 = vmov 1326507024  }
  0x17   : > { %v2400_v16 = vmul.f32 %v2391_v9, %v281_v13  ;;  %v2403_v17 = vmul.f32 %v2391_v9, %v282_v14  ;;  %v2406_v18 = vmul.f32 %v2391_v9, %v283_v15  ;;  %v2419_v41 = vadd.f32 %v276_v34, %v268_v33 }
  0x19   : > { %v298_v19 = vand.u32 2147483647, %v2400_v16  ;;  %v301_v20 = vand.u32 2139095040, %v2400_v16  ;;  %v401_v21 = vand.u32 2147483647, %v2403_v17  ;;  %v404_v22 = vand.u32 2139095040, %v2403_v17 }
  0x1a   : > { %v507_v29 = vand.u32 2139095040, %v2406_v18  ;;  %v504_v45 = vand.u32 2147483647, %v2406_v18  ;;  %vm300_vm13 = vcmp.lt.s32.totalorder %v2400_v16, 0 }
  0x1b   : > { %v302_v23 = vshrl.u32 %v301_v20, 23  ;;  %v305_v26 = vand.u32 8388607, %v298_v19  ;;  %v405_v27 = vshrl.u32 %v404_v22, 23  ;;  %v408_v28 = vand.u32 8388607, %v401_v21 }
  0x1c   : > { %v508_v32 = vshrl.u32 %v507_v29, 23  ;;  %vm2532_vm14 = vcmp.le.f32.partialorder %v298_v19, 0.7853982 }
  0x1d   : > { %v2141_v30 = vadd.s32 4294967169, %v302_v23  ;;  %v2145_v31 = vadd.s32 4294967169, %v405_v27  ;;  %v306_v36 = vor.u32 8388608, %v305_v26  ;;  %v409_v37 = vor.u32 8388608, %v408_v28 }
  0x1e   : > { %v2149_v39 = vadd.s32 4294967169, %v508_v32 }
  0x1f   : > { %v308_v35 = vadd.s32 1, %v2141_v30  ;;  %v411_v38 = vadd.s32 1, %v2145_v31  ;;  %v2422_v46 = vshll.u32 %v306_v36, 8  ;;  %v2424_v48 = vshll.u32 %v409_v37, 8 }
  0x20   : > { %v2426_v49 = vadd.s32 1, %v2149_v39 }
  0x21   : > { %vm309_vm0 = vcmp.gt.s32.totalorder %v308_v35, 0  ;;  %vm412_vm1 = vcmp.gt.s32.totalorder %v411_v38, 0 }
  0x22   : > { %v310_v40 = vsel %vm309_vm0, %v308_v35, 0  ;;  %v413_v44 = vsel %vm412_vm1, %v411_v38, 0  ;;  %vm515_vm6 = vcmp.gt.s32.totalorder %v2426_v49, 0 }
  0x23   : > { %v311_v42 = vshrl.u32 %v310_v40, 5  ;;  %v312_v43 = vand.u32 31, %v310_v40  ;;  %v415_v47 = vand.u32 31, %v413_v44  ;;  %v2433_v61 = vshrl.u32 %v413_v44, 5 }
  0x25   : > { %v313_v50 = vsub.s32 32, %v312_v43  ;;  %v315_v52 = vshll.u32 %v2311_v51, %v312_v43  ;;  %v318_v54 = vshll.u32 %v2312_v53, %v312_v43  ;;  %v321_v56 = vshll.u32 %v2313_v55, %v312_v43 }
  0x26   : > { %v324_v58 = vshll.u32 %v2314_v57, %v312_v43  ;;  %v327_v60 = vshll.u32 %v2315_v59, %v312_v43  ;;  %vm330_vm2 = vcmp.lt.s32.totalorder %v311_v42, 1  ;;  %vm331_vm3 = vcmp.lt.s32.totalorder %v311_v42, 2 }
  0x27   : > { %v314_v62 = vshrl.u32 %v2311_v51, %v313_v50  ;;  %v316_v63 = vshrl.u32 %v2312_v53, %v313_v50  ;;  %v319_v3 = vshrl.u32 %v2313_v55, %v313_v50  ;;  %v322_v4 = vshrl.u32 %v2314_v57, %v313_v50 }
  0x28   : > { %v325_v6 = vshrl.u32 %v2315_v59, %v313_v50  ;;  %v328_v11 = vshrl.u32 %v2316_v10, %v313_v50  ;;  %vm333_vm4 = vcmp.lt.s32.totalorder %v311_v42, 4  ;;  %v416_v15 = vsub.s32 32, %v415_v47 }
  0x29   : > { %v317_v12 = vor.u32 %v316_v63, %v315_v52  ;;  %v320_v13 = vor.u32 %v319_v3, %v318_v54  ;;  %v323_v14 = vor.u32 %v322_v4, %v321_v56  ;;  %vm332_vm5 = vcmp.lt.s32.totalorder %v311_v42, 3 }
  0x2a   : > { %v326_v20 = vor.u32 %v325_v6, %v324_v58  ;;  %v329_v22 = vor.u32 %v328_v11, %v327_v60  ;;  %v418_v23 = vshll.u32 %v2311_v51, %v415_v47  ;;  %v421_v31 = vshll.u32 %v2312_v53, %v415_v47 }
  0x2b   : > { %v334_v24 = vsel %vm330_vm2, %v314_v62, %v317_v12  ;;  %v335_v25 = vsel %vm333_vm4, %v323_v14, 2102212464  ;;  %v338_v26 = vsel %vm330_vm2, %v317_v12, %v320_v13  ;;  %v342_v27 = vsel %vm330_vm2, %v320_v13, %v323_v14 }
  0x2c   : > { %v336_v28 = vsel %vm332_vm5, %v320_v13, %v335_v25  ;;  %v339_v29 = vsel %vm333_vm4, %v326_v20, 920167782  ;;  %v343_v30 = vsel %vm333_vm4, %v329_v22, 1326507024  ;;  %v417_v34 = vshrl.u32 %v2311_v51, %v416_v15 }
  0x2d   : > { %v340_v32 = vsel %vm332_vm5, %v323_v14, %v339_v29  ;;  %v344_v33 = vsel %vm332_vm5, %v326_v20, %v343_v30  ;;  %v419_v35 = vshrl.u32 %v2312_v53, %v416_v15  ;;  %v337_v36 = vsel %vm331_vm3, %v334_v24, %v336_v28 }
  0x2e   : > { %v341_v37 = vsel %vm331_vm3, %v338_v26, %v340_v32  ;;  %v345_v38 = vsel %vm331_vm3, %v342_v27, %v344_v33  ;;  %v422_v39 = vshrl.u32 %v2313_v55, %v416_v15  ;;  %v424_v56 = vshll.u32 %v2313_v55, %v415_v47 }
  0x2f   : > { %v2454_v40 = vmul.u32.u64.low %v2422_v46, %v345_v38  ;;  %v2455_v43 = vmul.u32.u64.high %v2422_v46, %v345_v38, %v2454_v40  ;;  %v2458_v44 = vmul.u32.u64.low %v2422_v46, %v341_v37  ;;  %v2459_v50 = vmul.u32.u64.high %v2422_v46, %v341_v37, %v2458_v44 }
  0x30   : > { %v420_v52 = vor.u32 %v419_v35, %v418_v23  ;;  %v423_v54 = vor.u32 %v422_v39, %v421_v31  ;;  %v425_v58 = vshrl.u32 %v2314_v57, %v416_v15  ;;  %v427_v42 = vshll.u32 %v2314_v57, %v415_v47 }
  0x31   : > { %v428_v60 = vshrl.u32 %v2315_v59, %v416_v15  ;;  %v430_v62 = vshll.u32 %v2315_v59, %v415_v47  ;;  %v431_v63 = vshrl.u32 %v2316_v10, %v416_v15  ;;  %v353_v3 = vmul.u32 %v2422_v46, %v337_v36 }
  0x32   : > { %v426_v4 = vor.u32 %v425_v58, %v424_v56  ;;  %vm433_vm7 = vcmp.lt.s32.totalorder %v2433_v61, 1  ;;  %vm434_vm8 = vcmp.lt.s32.totalorder %v2433_v61, 2  ;;  %vm355_vm9 = vc.u32 %v2455_v43, %v2458_v44 }
  0x33   : > { %v356_v6 = vadd.s32 1, %v2459_v50  ;;  %v429_v11 = vor.u32 %v428_v60, %v427_v42  ;;  %vm435_vm10 = vcmp.lt.s32.totalorder %v2433_v61, 3  ;;  %v432_v12 = vor.u32 %v431_v63, %v430_v62 }
  0x34   : > { %vm436_vm11 = vcmp.lt.s32.totalorder %v2433_v61, 4  ;;  %v437_v47 = vsel %vm433_vm7, %v417_v34, %v420_v52  ;;  %v441_v13 = vsel %vm433_vm7, %v420_v52, %v423_v54  ;;  %v445_v20 = vsel %vm433_vm7, %v423_v54, %v426_v4  ;;  %v261_v52 = vld [vmem:[%s2365_s26 + $0x20] sm:$0xff] }
  0x35   : > { %v357_v46 = vsel %vm355_vm9, %v356_v6, %v2459_v50  ;;  %v438_v14 = vsel %vm436_vm11, %v426_v4, 2102212464  ;;  %v442_v15 = vsel %vm436_vm11, %v429_v11, 920167782  ;;  %v446_v25 = vsel %vm436_vm11, %v432_v12, 1326507024 }
  0x36   : > { %v358_v22 = vadd.s32 %v357_v46, %v353_v3  ;;  %v439_v23 = vsel %vm435_vm10, %v423_v54, %v438_v14  ;;  %v443_v24 = vsel %vm435_vm10, %v426_v4, %v442_v15  ;;  %v447_v28 = vsel %vm435_vm10, %v429_v11, %v446_v25  ;;  %v253_v50 = vld [vmem:[%s2359_s23 + $0x20] sm:$0xff]  ;;  %v254_v54 = vld [vmem:[%s2359_s23 + $0x28] sm:$0xff] }
  0x37   : > { %v440_v26 = vsel %vm434_vm8, %v437_v47, %v439_v23  ;;  %v444_v27 = vsel %vm434_vm8, %v441_v13, %v443_v24  ;;  %v516_v29 = vsel %vm515_vm6, %v2426_v49, 0  ;;  %v448_v31 = vsel %vm434_vm8, %v445_v20, %v447_v28 }
  0x38   : > { %v359_v30 = vadd.s32 536870912, %v358_v22  ;;  %v2487_v32 = vmul.u32.u64.low %v2424_v48, %v444_v27  ;;  %v2488_v33 = vmul.u32.u64.high %v2424_v48, %v444_v27, %v2487_v32  ;;  %v511_v36 = vand.u32 8388607, %v504_v45 }
  0x39   : > { %v2492_v34 = vmul.u32.u64.low %v2424_v48, %v448_v31  ;;  %v2493_v35 = vmul.u32.u64.high %v2424_v48, %v448_v31, %v2492_v34  ;;  %v518_v38 = vand.u32 31, %v516_v29  ;;  %v456_v49 = vmul.u32 %v2424_v48, %v440_v26 }
  0x3a   : > { %v360_v37 = vshrl.u32 %v359_v30, 30  ;;  %v459_v61 = vadd.s32 1, %v2488_v33  ;;  %v2501_v40 = vmul.f32 %v2391_v9, %v2419_v41  ;;  %v512_v56 = vor.u32 8388608, %v511_v36 }
  0x3b   : > { %vm458_vm12 = vc.u32 %v2493_v35, %v2487_v32  ;;  %v519_v60 = vsub.s32 32, %v518_v38  ;;  %v2511_v62 = vmul.f32 %v253_v50, %v253_v50  ;;  %v2513_v63 = vmul.f32 %v261_v52, %v261_v52 }
  0x3c   : > { %v361_v39 = vshll.u32 %v360_v37, 30  ;;  %v460_v42 = vsel %vm458_vm12, %v459_v61, %v2488_v33  ;;  %v2515_v3 = vmul.f32 %v254_v54, %v254_v54  ;;  %v607_v4 = vand.u32 2147483647, %v2501_v40 }
  0x3d   : > { %v461_v48 = vadd.s32 %v460_v42, %v456_v49  ;;  %v610_v6 = vand.u32 2139095040, %v2501_v40  ;;  %v2521_v12 = vshrl.u32 %v516_v29, 5  ;;  %v521_v47 = vshll.u32 %v2311_v51, %v518_v38 }
  0x3e   : > { %v2508_v58 = vsub.s32 %v358_v22, %v361_v39  ;;  %v2524_v13 = vshll.u32 %v512_v56, 8  ;;  %v522_v14 = vshrl.u32 %v2312_v53, %v519_v60  ;;  %v524_v15 = vshll.u32 %v2312_v53, %v518_v38 }
  0x3f   : > { %v462_v11 = vadd.s32 536870912, %v461_v48  ;;  %v525_v20 = vshrl.u32 %v2313_v55, %v519_v60  ;;  %v527_v24 = vshll.u32 %v2313_v55, %v518_v38  ;;  %v528_v25 = vshrl.u32 %v2314_v57, %v519_v60 }
  0x40   : > { %v364_v41 = vsub.s32 0, %v2508_v58  ;;  %v530_v26 = vshll.u32 %v2314_v57, %v518_v38  ;;  %v384_v28 = vsub.s32 4, %v360_v37  ;;  %v531_v29 = vshrl.u32 %v2315_v59, %v519_v60 }
  0x41   : > { %v2536_v23 = vshrl.u32 %v462_v11, 30  ;;  %v611_v30 = vshrl.u32 %v610_v6, 23  ;;  %v533_v19 = vshll.u32 %v2315_v59, %v518_v38  ;;  %v534_v33 = vshrl.u32 %v2316_v10, %v519_v60 }
  0x42   : > { %v2142_v46 = vmin.u32 %v364_v41, %v2508_v58  ;;  %vm539_vm15 = vcmp.lt.s32.totalorder %v2521_v12, 4  ;;  %v354_v34 = vadd.s32 %v2458_v44, %v2455_v43  ;;  %v532_v49 = vor.u32 %v531_v29, %v530_v26 }
  0x43   : > { %v464_v31 = vshll.u32 %v2536_v23, 30  ;;  %vm536_vm0 = vcmp.lt.s32.totalorder %v2521_v12, 1  ;;  %v523_v61 = vor.u32 %v522_v14, %v521_v47  ;;  %v526_v50 = vor.u32 %v525_v20, %v524_v15 }
  0x44   : > { %v366_v27 = vclz %v2142_v46  ;;  %v529_v52 = vor.u32 %v528_v25, %v527_v24  ;;  %v385_v38 = vsel %vm300_vm13, %v384_v28, %v360_v37  ;;  %vm538_vm2 = vcmp.lt.s32.totalorder %v2521_v12, 3 }
  0x45   : > { %v2549_v39 = vsub.s32 %v461_v48, %v464_v31  ;;  %v545_v54 = vsel %vm539_vm15, %v532_v49, 920167782  ;;  %v520_v44 = vshrl.u32 %v2311_v51, %v519_v60  ;;  %v535_v42 = vor.u32 %v534_v33, %v533_v19 }
  0x46   : > { %v2143_v36 = vadd.s32 4294967294, %v366_v27  ;;  %v541_v11 = vsel %vm539_vm15, %v529_v52, 2102212464  ;;  %vm403_vm3 = vcmp.lt.s32.totalorder %v2403_v17, 0  ;;  %vm537_vm4 = vcmp.lt.s32.totalorder %v2521_v12, 2 }
  0x47   : > { %v467_v43 = vsub.s32 0, %v2549_v39  ;;  %v544_v47 = vsel %vm536_vm0, %v523_v61, %v526_v50  ;;  %v546_v60 = vsel %vm538_vm2, %v529_v52, %v545_v54  ;;  %v2153_v15 = vadd.s32 4294967169, %v611_v30 }
  0x48   : > { %vm2144_vm1 = vcmp.lt.s32.totalorder %v2143_v36, 0  ;;  %v540_v24 = vsel %vm536_vm0, %v520_v44, %v523_v61  ;;  %v542_v25 = vsel %vm538_vm2, %v526_v50, %v541_v11  ;;  %v548_v26 = vsel %vm536_vm0, %v526_v50, %v529_v52 }
  0x49   : > { %v369_v56 = vsel %vm2144_vm1, 0, %v2143_v36  ;;  %v2146_v37 = vmin.u32 %v467_v43, %v2549_v39  ;;  %v547_v29 = vsel %vm537_vm4, %v544_v47, %v546_v60  ;;  %v549_v31 = vsel %vm539_vm15, %v535_v42, 1326507024 }
  0x4a   : > { %v370_v48 = vsub.s32 32, %v369_v56  ;;  %v371_v41 = vshll.u32 %v2508_v58, %v369_v56  ;;  %v374_v6 = vsub.s32 4294967266, %v369_v56  ;;  %v387_v58 = vsel %vm2532_vm14, 0, %v385_v38 }
  0x4b   : > { %v469_v20 = vclz %v2146_v37  ;;  %v1215_v19 = vadd.s32 3, %v387_v58  ;;  %vm2582_vm5 = vcmp.le.f32.partialorder %v401_v21, 0.7853982  ;;  %v457_v33 = vadd.s32 %v2487_v32, %v2493_v35 }
  0x4c   : > { %v372_v46 = vshrl.u32 %v354_v34, %v370_v48  ;;  %v375_v14 = vadd.s32 127, %v374_v6  ;;  %v487_v36 = vsub.s32 4, %v2536_v23  ;;  %v543_v52 = vsel %vm537_vm4, %v540_v24, %v542_v25 }
  0x4d   : > { %v2147_v34 = vadd.s32 4294967294, %v469_v20  ;;  %v550_v38 = vsel %vm538_vm2, %v532_v49, %v549_v31  ;;  %v2596_v54 = vmul.u32.u64.low %v2524_v13, %v547_v29  ;;  %v2597_v56 = vmul.u32.u64.high %v2524_v13, %v547_v29, %v2596_v54 }
  0x4e   : > { %v373_v27 = vor.u32 %v372_v46, %v371_v41  ;;  %v376_v28 = vshll.u32 %v375_v14, 23  ;;  %v551_v21 = vsel %vm537_vm4, %v548_v26, %v550_v38  ;;  %v617_v41 = vadd.s32 1, %v2153_v15  ;;  %v262_v15 = vld [vmem:[%s2365_s26 + $0x28] sm:$0xff] }
  0x4f   : > { %vm2148_vm6 = vcmp.lt.s32.totalorder %v2147_v34, 0  ;;  %v2601_v43 = vmul.u32.u64.low %v2524_v13, %v551_v21  ;;  %v2602_v44 = vmul.u32.u64.high %v2524_v13, %v551_v21, %v2601_v43  ;;  %v488_v12 = vsel %vm403_vm3, %v487_v36, %v2536_v23 }
  0x50   : > { %v377_v61 = vor.u32 4788187, %v376_v28  ;;  %v380_v50 = vcvt.s32.f32 %v373_v27  ;;  %v472_v35 = vsel %vm2148_vm6, 0, %v2147_v34  ;;  %v559_v11 = vmul.u32 %v2524_v13, %v543_v52 }
  0x51   : > { %v473_v42 = vsub.s32 32, %v472_v35  ;;  %v474_v48 = vshll.u32 %v2549_v39, %v472_v35  ;;  %v477_v49 = vsub.s32 4294967266, %v472_v35  ;;  %v614_v37 = vand.u32 8388607, %v607_v4 }
  0x52   : > { %v378_v32 = vand.u32 2147483647, %v377_v61  ;;  %v562_v46 = vadd.s32 1, %v2597_v56  ;;  %vm618_vm7 = vcmp.gt.s32.totalorder %v617_v41, 0  ;;  %v2612_v20 = vand.u32 3, %v387_v58 }
  0x53   : > { %v475_v47 = vshrl.u32 %v457_v33, %v473_v42  ;;  %v478_v60 = vadd.s32 127, %v477_v49  ;;  %vm561_vm8 = vc.u32 %v2602_v44, %v2596_v54  ;;  %v619_v39 = vsel %vm618_vm7, %v617_v41, 0 }
  0x54   : > { %v381_v6 = vmul.f32 %v380_v50, %v378_v32  ;;  %v2617_v24 = vand.u32 3, %v1215_v19  ;;  %v563_v25 = vsel %vm561_vm8, %v562_v46, %v2597_v56  ;;  %v490_v27 = vsel %vm2582_vm5, 0, %v488_v12 }
  0x55   : > { %v476_v23 = vor.u32 %v475_v47, %v474_v48  ;;  %v479_v13 = vshll.u32 %v478_v60, 23  ;;  %v564_v28 = vadd.s32 %v563_v25, %v559_v11  ;;  %v621_v58 = vand.u32 31, %v619_v39 }
  0x56   : > { %v382_v14 = vxor.u32 2147483648, %v381_v6  ;;  %v2627_v19 = vmul.f32 %v262_v15, %v262_v15  ;;  %v285_v61 = vadd.f32 %v2513_v63, %v2511_v62  ;;  %v1319_v52 = vadd.s32 3, %v490_v27 }
  0x57   : > { %v480_v31 = vor.u32 4788187, %v479_v13  ;;  %v483_v33 = vcvt.s32.f32 %v476_v23  ;;  %v565_v34 = vadd.s32 536870912, %v564_v28  ;;  %v622_v36 = vsub.s32 32, %v621_v58 }
  0x58   : > { %v383_v26 = vsel %vm300_vm13, %v382_v14, %v381_v6  ;;  %v615_v38 = vor.u32 8388608, %v614_v37  ;;  %vm396_vm9 = vcmp.eq.s32.totalorder %v2612_v20, 2  ;;  %vm1221_vm10 = vcmp.eq.s32.totalorder %v2617_v24, 2 }
  0x59   : > { %v386_v29 = vsel %vm2532_vm14, %v2400_v16, %v383_v26  ;;  %v481_v50 = vand.u32 2147483647, %v480_v31  ;;  %v2633_v22 = vshrl.u32 %v565_v34, 30  ;;  %v2635_v21 = vshrl.u32 %v619_v39, 5 }
  0x5a   : > { %2257 = vcosq.f32 %v386_v29  ;;  %v624_v56 = vshll.u32 %v2311_v51, %v621_v58  ;;  %vm393_vm11 = vcmp.eq.s32.totalorder %v2612_v20, 0  ;;  %vm1218_vm12 = vcmp.eq.s32.totalorder %v2617_v24, 0 }
  0x5b   : > { %2259 = vsinq.f32 %v386_v29  ;;  %v484_v32 = vmul.f32 %v483_v33, %v481_v50  ;;  %v625_v62 = vshrl.u32 %v2312_v53, %v622_v36  ;;  %v630_v63 = vshll.u32 %v2313_v55, %v621_v58 }
  0x5c   : > { %v631_v35 = vshrl.u32 %v2314_v57, %v622_v36  ;;  %vm392_vm13 = vcmp.lt.s32.totalorder %v2612_v20, 2  ;;  %vm1217_vm14 = vcmp.lt.s32.totalorder %v2617_v24, 2  ;;  %v2645_v43 = vand.u32 3, %v490_v27 }
  0x5d   : > { %v567_v42 = vshll.u32 %v2633_v22, 30  ;;  %v627_v48 = vshll.u32 %v2312_v53, %v621_v58  ;;  %v628_v49 = vshrl.u32 %v2313_v55, %v622_v36  ;;  %vm390_vm15 = vweird.f32 %v2400_v16 }
  0x5e   : > { %v485_v41 = vxor.u32 2147483648, %v484_v32  ;;  %v2651_v6 = vand.u32 3, %v1319_v52  ;;  %v2653_v12 = vshll.u32 %v615_v38, 8  ;;  %v2656_v11 = vmul.f32 %v2391_v9, %v285_v61 }
  0x5f   : > { %v2658_v37 = vsub.s32 %v564_v28, %v567_v42  ;;  %v623_v47 = vshrl.u32 %v2311_v51, %v622_v36  ;;  %v633_v60 = vshll.u32 %v2314_v57, %v621_v58  ;;  %vm639_vm0 = vcmp.lt.s32.totalorder %v2635_v21, 1 }
  0x60   : > { %v486_v46 = vsel %vm403_vm3, %v485_v41, %v484_v32  ;;  %v626_v14 = vor.u32 %v625_v62, %v624_v56  ;;  %v632_v39 = vor.u32 %v631_v35, %v630_v63  ;;  %v634_v15 = vshrl.u32 %v2315_v59, %v622_v36 }
  0x61   : > { %v489_v23 = vsel %vm2582_vm5, %v2403_v17, %v486_v46  ;;  %v570_v13 = vsub.s32 0, %v2658_v37  ;;  %v629_v25 = vor.u32 %v628_v49, %v627_v48  ;;  %vm642_vm1 = vcmp.lt.s32.totalorder %v2635_v21, 4 }
  0x62   : > { %2261 = vcosq.f32 %v489_v23  ;;  %v636_v26 = vshll.u32 %v2315_v59, %v621_v58  ;;  %v637_v27 = vshrl.u32 %v2316_v10, %v622_v36  ;;  %v644_v28 = vsel %vm642_vm1, %v632_v39, 2102212464 }
  0x63   : > { %2263 = vsinq.f32 %v489_v23  ;;  %v2150_v31 = vmin.u32 %v570_v13, %v2658_v37  ;;  %vm641_vm2 = vcmp.lt.s32.totalorder %v2635_v21, 3  ;;  %v643_v30 = vsel %vm639_vm0, %v623_v47, %v626_v14 }
  0x64   : > { %v2258_v29 = vpop.eup %2257  ;;  %v560_v58 = vadd.s32 %v2596_v54, %v2602_v44  ;;  %v635_v36 = vor.u32 %v634_v15, %v633_v60  ;;  %v645_v61 = vsel %vm641_vm2, %v629_v25, %v644_v28  ;;  %vm496_vm5 = vcmp.eq.s32.totalorder %v2645_v43, 0 }
  0x65   : > { %v2260_v33 = vpop.eup %2259  ;;  %v397_v34 = vxor.u32 2147483648, %v2258_v29  ;;  %vm1322_vm6 = vcmp.eq.s32.totalorder %v2651_v6, 0  ;;  %vm506_vm7 = vcmp.lt.s32.totalorder %v2406_v18, 0  ;;  %v572_v52 = vclz %v2150_v31 }
  0x66   : > { %v394_v50 = vxor.u32 2147483648, %v2260_v33  ;;  %v590_v38 = vsub.s32 4, %v2633_v22  ;;  %vm640_vm8 = vcmp.lt.s32.totalorder %v2635_v21, 2  ;;  %vm495_vm4 = vcmp.lt.s32.totalorder %v2645_v43, 2 }
  0x67   : > { %v398_v56 = vsel %vm396_vm9, %v397_v34, %v2260_v33  ;;  %v1223_v54 = vsel %vm1221_vm10, %v397_v34, %v2260_v33  ;;  %vm1321_vm3 = vcmp.lt.s32.totalorder %v2651_v6, 2  ;;  %v638_v44 = vor.u32 %v637_v27, %v636_v26 }
  0x68   : > { %v646_v32 = vsel %vm640_vm8, %v643_v30, %v645_v61  ;;  %v395_v62 = vsel %vm393_vm11, %v2258_v29, %v394_v50  ;;  %v1220_v63 = vsel %vm1218_vm12, %v2258_v29, %v394_v50  ;;  %vm493_vm9 = vweird.f32 %v2403_v17 }
  0x69   : > { %v2151_v35 = vadd.s32 4294967294, %v572_v52  ;;  %v647_v42 = vsel %vm639_vm0, %v626_v14, %v629_v25  ;;  %v399_v48 = vsel %vm392_vm13, %v395_v62, %v398_v56  ;;  %v1224_v49 = vsel %vm1217_vm14, %v1220_v63, %v1223_v54 }
  0x6a   : > { %v648_v41 = vsel %vm642_vm1, %v635_v36, 920167782  ;;  %v651_v47 = vsel %vm639_vm0, %v629_v25, %v632_v39  ;;  %v2715_v60 = vsel %vm390_vm15, nan, %v399_v48  ;;  %v2719_v46 = vsel %vm390_vm15, nan, %v1224_v49 }
  0x6b   : > { %vm2152_vm10 = vcmp.lt.s32.totalorder %v2151_v35, 0  ;;  %v649_v20 = vsel %vm641_vm2, %v632_v39, %v648_v41  ;;  %v1954_v24 = vmul.f32 %v2715_v60, %v2368_v0  ;;  %v1962_v14 = vmul.f32 %v2719_v46, %v2371_v1 }
  0x6c   : > { %v575_v15 = vsel %vm2152_vm10, 0, %v2151_v35  ;;  %v650_v23 = vsel %vm640_vm8, %v647_v42, %v649_v20  ;;  %v652_v0 = vsel %vm642_vm1, %v638_v44, 1326507024  ;;  %v2262_v25 = vpop.eup %2261  ;;  %v591_v61 = vsel %vm506_vm7, %v590_v38, %v2633_v22 }
  0x6d   : > { %v576_v16 = vsub.s32 32, %v575_v15  ;;  %v577_v13 = vshll.u32 %v2658_v37, %v575_v15  ;;  %v580_v39 = vsub.s32 4294967266, %v575_v15  ;;  %v1970_v26 = vadd.f32 %v1962_v14, %v1954_v24  ;;  %v2264_v29 = vpop.eup %2263 }
  0x6e   : > { %v653_v1 = vsel %vm641_vm2, %v635_v36, %v652_v0  ;;  %v2741_v27 = vmul.u32.u64.low %v2653_v12, %v650_v23  ;;  %v2742_v28 = vmul.u32.u64.high %v2653_v12, %v650_v23, %v2741_v27  ;;  %v500_v31 = vxor.u32 2147483648, %v2262_v25 }
  0x6f   : > { %v578_v30 = vshrl.u32 %v560_v58, %v576_v16  ;;  %v581_v33 = vadd.s32 127, %v580_v39  ;;  %v654_v37 = vsel %vm640_vm8, %v651_v47, %v653_v1  ;;  %1978 = vst [vmem:[%s2733_s29] sm:$0xff] %v1970_v26  ;;  %v497_v34 = vxor.u32 2147483648, %v2264_v29  ;;  %v255_v16 = vld [vmem:[%s2359_s23 + $0x30] sm:$0xff] }
  0x70   : > { %v2752_v36 = vmul.u32.u64.low %v2653_v12, %v654_v37  ;;  %v2753_v50 = vmul.u32.u64.high %v2653_v12, %v654_v37, %v2752_v36  ;;  %vm3338_vm11 = vcmp.eq.s32.totalorder %v2645_v43, 2  ;;  %vm3339_vm12 = vcmp.eq.s32.totalorder %v2651_v6, 2 }
  0x71   : > { %v501_v52 = vsel %vm3338_vm11, %v500_v31, %v2264_v29  ;;  %v1327_v58 = vsel %vm3339_vm12, %v500_v31, %v2264_v29  ;;  %v579_v56 = vor.u32 %v578_v30, %v577_v13  ;;  %v582_v54 = vshll.u32 %v581_v33, 23 }
  0x72   : > { %v498_v21 = vsel %vm496_vm5, %v2262_v25, %v497_v34  ;;  %v1324_v44 = vsel %vm1322_vm6, %v2262_v25, %v497_v34  ;;  %v662_v22 = vmul.u32 %v2653_v12, %v646_v32  ;;  %v665_v38 = vadd.s32 1, %v2742_v28 }
  0x73   : > { %v502_v62 = vsel %vm495_vm4, %v498_v21, %v501_v52  ;;  %v1328_v63 = vsel %vm1321_vm3, %v1324_v44, %v1327_v58  ;;  %v583_v35 = vor.u32 4788187, %v582_v54  ;;  %v586_v42 = vcvt.s32.f32 %v579_v56 }
  0x74   : > { %v2771_v48 = vsel %vm493_vm9, nan, %v502_v62  ;;  %v2775_v49 = vsel %vm493_vm9, nan, %v1328_v63  ;;  %vm2779_vm13 = vcmp.le.f32.partialorder %v504_v45, 0.7853982  ;;  %vm664_vm14 = vc.u32 %v2753_v50, %v2741_v27 }
  0x75   : > { %v1955_v43 = vmul.f32 %v2771_v48, %v2374_v2  ;;  %v1963_v17 = vmul.f32 %v2775_v49, %v2381_v5  ;;  %v584_v6 = vand.u32 2147483647, %v583_v35  ;;  %v666_v32 = vsel %vm664_vm14, %v665_v38, %v2742_v28  ;;  %v263_v5 = vld [vmem:[%s2365_s26 + $0x30] sm:$0xff] }
  0x76   : > { %v593_v45 = vsel %vm2779_vm13, 0, %v591_v61  ;;  %v667_v41 = vadd.s32 %v666_v32, %v662_v22  ;;  %v710_v47 = vand.u32 2147483647, %v2656_v11  ;;  %v713_v20 = vand.u32 2139095040, %v2656_v11 }
  0x77   : > { %v1971_v24 = vadd.f32 %v1963_v17, %v1955_v43  ;;  %v587_v14 = vmul.f32 %v586_v42, %v584_v6  ;;  %v286_v15 = vadd.f32 %v2627_v19, %v2515_v3  ;;  %v1423_v39 = vadd.s32 3, %v593_v45 }
  0x78   : > { %v668_v2 = vadd.s32 536870912, %v667_v41  ;;  %v714_v23 = vshrl.u32 %v713_v20, 23  ;;  %v717_v1 = vand.u32 8388607, %v710_v47  ;;  %v271_v19 = vmul.f32 %v255_v16, %v255_v16 }
  0x79   : > { %1979 = vst [vmem:[%s2733_s29 + $0x8] sm:$0xff] %v1971_v24  ;;  %v588_v13 = vxor.u32 2147483648, %v587_v14  ;;  %v2800_v0 = vmul.f32 %v2391_v9, %v286_v15  ;;  %v279_v29 = vmul.f32 %v263_v5, %v263_v5  ;;  %v2810_v30 = vand.u32 3, %v593_v45 }
  0x7a   : > { %v669_v25 = vshrl.u32 %v668_v2, 30  ;;  %v2157_v26 = vadd.s32 4294967169, %v714_v23  ;;  %v2812_v34 = vand.u32 3, %v1423_v39  ;;  %v718_v52 = vor.u32 8388608, %v717_v1 }
  0x7b   : > { %v589_v28 = vsel %vm506_vm7, %v588_v13, %v587_v14  ;;  %v816_v3 = vand.u32 2139095040, %v2800_v0  ;;  %vm609_vm0 = vcmp.lt.s32.totalorder %v2501_v40, 0  ;;  %v287_v56 = vadd.f32 %v279_v29, %v271_v19 }
  0x7c   : > { %v592_v31 = vsel %vm2779_vm13, %v2406_v18, %v589_v28  ;;  %v670_v33 = vshll.u32 %v669_v25, 30  ;;  %v720_v37 = vadd.s32 1, %v2157_v26  ;;  %vm599_vm1 = vcmp.eq.s32.totalorder %v2810_v30, 0 }
  0x7d   : > { %2265 = vcosq.f32 %v592_v31  ;;  %v817_v61 = vshrl.u32 %v816_v3, 23  ;;  %v693_v21 = vsub.s32 4, %v669_v25  ;;  %vm598_vm2 = vcmp.lt.s32.totalorder %v2810_v30, 2 }
  0x7e   : > { %2267 = vsinq.f32 %v592_v31  ;;  %v2814_v36 = vsub.s32 %v667_v41, %v670_v33  ;;  %vm721_vm15 = vcmp.gt.s32.totalorder %v720_v37, 0  ;;  %vm602_vm3 = vcmp.eq.s32.totalorder %v2810_v30, 2 }
  0x7f   : > { %v722_v58 = vsel %vm721_vm15, %v720_v37, 0  ;;  %v2161_v44 = vadd.s32 4294967169, %v817_v61  ;;  %vm1425_vm4 = vcmp.lt.s32.totalorder %v2812_v34, 2  ;;  %vm1426_vm5 = vcmp.eq.s32.totalorder %v2812_v34, 0 }
  0x80   : > { %v673_v54 = vsub.s32 0, %v2814_v36  ;;  %v724_v22 = vand.u32 31, %v722_v58  ;;  %vm596_vm6 = vweird.f32 %v2406_v18  ;;  %vm1429_vm7 = vcmp.eq.s32.totalorder %v2812_v34, 2 }
  0x81   : > { %v663_v38 = vadd.s32 %v2741_v27, %v2753_v50  ;;  %v2828_v63 = vshll.u32 %v718_v52, 8  ;;  %v2830_v35 = vshrl.u32 %v722_v58, 5  ;;  %v813_v12 = vand.u32 2147483647, %v2800_v0 }
  0x82   : > { %v2154_v62 = vmin.u32 %v673_v54, %v2814_v36  ;;  %v725_v42 = vsub.s32 32, %v724_v22  ;;  %v2834_v43 = vmul.f32 %v2391_v9, %v287_v56  ;;  %v2838_v6 = vsel %vm609_vm0, %v693_v21, %v669_v25 }
  0x83   : > { %v727_v32 = vshll.u32 %v2311_v51, %v724_v22  ;;  %v2841_v27 = vadd.s32 1, %v2161_v44  ;;  %v730_v50 = vshll.u32 %v2312_v53, %v724_v22  ;;  %v733_v45 = vshll.u32 %v2313_v55, %v724_v22 }
  0x84   : > { %v675_v17 = vclz %v2154_v62  ;;  %v736_v41 = vshll.u32 %v2314_v57, %v724_v22  ;;  %v739_v20 = vshll.u32 %v2315_v59, %v724_v22  ;;  %v728_v14 = vshrl.u32 %v2312_v53, %v725_v42 }
  0x85   : > { %v731_v15 = vshrl.u32 %v2313_v55, %v725_v42  ;;  %v734_v2 = vshrl.u32 %v2314_v57, %v725_v42  ;;  %v726_v16 = vshrl.u32 %v2311_v51, %v725_v42  ;;  %v737_v5 = vshrl.u32 %v2315_v59, %v725_v42 }
  0x86   : > { %v2155_v24 = vadd.s32 4294967294, %v675_v17  ;;  %v740_v13 = vshrl.u32 %v2316_v10, %v725_v42  ;;  %vm742_vm8 = vcmp.lt.s32.totalorder %v2830_v35, 1  ;;  %v729_v26 = vor.u32 %v728_v14, %v727_v32 }
  0x87   : > { %v2266_v23 = vpop.eup %2265  ;;  %vm743_vm10 = vcmp.lt.s32.totalorder %v2830_v35, 2  ;;  %v732_v3 = vor.u32 %v731_v15, %v730_v50  ;;  %v735_v19 = vor.u32 %v734_v2, %v733_v45  ;;  %vm2861_vm11 = vcmp.le.f32.partialorder %v607_v4, 0.7853982 }
  0x88   : > { %v2268_v39 = vpop.eup %2267  ;;  %v603_v25 = vxor.u32 2147483648, %v2266_v23  ;;  %vm2156_vm9 = vcmp.lt.s32.totalorder %v2155_v24, 0  ;;  %v738_v54 = vor.u32 %v737_v5, %v736_v41  ;;  %vm744_vm12 = vcmp.lt.s32.totalorder %v2830_v35, 3 }
  0x89   : > { %v600_v1 = vxor.u32 2147483648, %v2268_v39  ;;  %v678_v28 = vsel %vm2156_vm9, 0, %v2155_v24  ;;  %vm745_vm13 = vcmp.lt.s32.totalorder %v2830_v35, 4  ;;  %v741_v42 = vor.u32 %v740_v13, %v739_v20 }
  0x8a   : > { %v604_v29 = vsel %vm602_vm3, %v603_v25, %v2268_v39  ;;  %v1431_v31 = vsel %vm1429_vm7, %v603_v25, %v2268_v39  ;;  %v679_v37 = vsub.s32 32, %v678_v28  ;;  %v680_v61 = vshll.u32 %v2814_v36, %v678_v28 }
  0x8b   : > { %v601_v52 = vsel %vm599_vm1, %v2266_v23, %v600_v1  ;;  %v1428_v58 = vsel %vm1426_vm5, %v2266_v23, %v600_v1  ;;  %v683_v56 = vsub.s32 4294967266, %v678_v28  ;;  %v747_v32 = vsel %vm745_vm13, %v735_v19, 2102212464 }
  0x8c   : > { %v605_v21 = vsel %vm598_vm2, %v601_v52, %v604_v29  ;;  %v1432_v4 = vsel %vm1425_vm4, %v1428_v58, %v1431_v31  ;;  %v681_v44 = vshrl.u32 %v663_v38, %v679_v37  ;;  %v750_v18 = vsel %vm742_vm8, %v729_v26, %v732_v3 }
  0x8d   : > { %v2877_v36 = vsel %vm596_vm6, nan, %v605_v21  ;;  %v2881_v22 = vsel %vm596_vm6, nan, %v1432_v4  ;;  %v684_v62 = vadd.s32 127, %v683_v56  ;;  %v751_v50 = vsel %vm745_vm13, %v738_v54, 920167782 }
  0x8e   : > { %v1956_v30 = vmul.f32 %v2877_v36, %v2386_v7  ;;  %v1964_v34 = vmul.f32 %v2881_v22, %v2389_v8  ;;  %v682_v38 = vor.u32 %v681_v44, %v680_v61  ;;  %v746_v7 = vsel %vm742_vm8, %v726_v16, %v729_v26 }
  0x8f   : > { %v685_v17 = vshll.u32 %v684_v62, 23  ;;  %v752_v8 = vsel %vm744_vm12, %v735_v19, %v751_v50  ;;  %v748_v20 = vsel %vm744_vm12, %v732_v3, %v747_v32  ;;  %v754_v15 = vsel %vm742_vm8, %v732_v3, %v735_v19 }
  0x90   : > { %v1972_v45 = vadd.f32 %v1964_v34, %v1956_v30  ;;  %v689_v41 = vcvt.s32.f32 %v682_v38  ;;  %v753_v14 = vsel %vm743_vm10, %v750_v18, %v752_v8  ;;  %v755_v2 = vsel %vm745_vm13, %v741_v42, 1326507024 }
  0x91   : > { %v686_v24 = vor.u32 4788187, %v685_v17  ;;  %v2908_v23 = vmul.u32.u64.low %v2828_v63, %v753_v14  ;;  %v2909_v16 = vmul.u32.u64.high %v2828_v63, %v753_v14, %v2908_v23  ;;  %v820_v5 = vand.u32 8388607, %v813_v12 }
  0x92   : > { %1980 = vst [vmem:[%s2733_s29 + $0x10] sm:$0xff] %v1972_v45  ;;  %v696_v39 = vsel %vm2861_vm11, 0, %v2838_v6  ;;  %v756_v25 = vsel %vm744_vm12, %v738_v54, %v755_v2  ;;  %vm824_vm14 = vcmp.gt.s32.totalorder %v2841_v27, 0  ;;  %v749_v26 = vsel %vm743_vm10, %v746_v7, %v748_v20 }
  0x93   : > { %v687_v13 = vand.u32 2147483647, %v686_v24  ;;  %v757_v1 = vsel %vm743_vm10, %v754_v15, %v756_v25  ;;  %v825_v28 = vsel %vm824_vm14, %v2841_v27, 0  ;;  %v919_v3 = vand.u32 2139095040, %v2834_v43 }
  0x94   : > { %v2927_v29 = vmul.u32.u64.low %v2828_v63, %v757_v1  ;;  %v2928_v31 = vmul.u32.u64.high %v2828_v63, %v757_v1, %v2927_v29  ;;  %v2930_v6 = vshrl.u32 %v825_v28, 5  ;;  %v2932_v37 = vand.u32 3, %v696_v39 }
  0x95   : > { %v690_v19 = vmul.f32 %v689_v41, %v687_v13  ;;  %v768_v61 = vadd.s32 1, %v2909_v16  ;;  %v821_v52 = vor.u32 8388608, %v820_v5  ;;  %v827_v58 = vand.u32 31, %v825_v28 }
  0x96   : > { %v1527_v35 = vadd.s32 3, %v696_v39  ;;  %v765_v54 = vmul.u32 %v2828_v63, %v749_v26  ;;  %v920_v27 = vshrl.u32 %v919_v3, 23  ;;  %vm845_vm15 = vcmp.lt.s32.totalorder %v2930_v6, 1 }
  0x97   : > { %v691_v56 = vxor.u32 2147483648, %v690_v19  ;;  %v828_v21 = vsub.s32 32, %v827_v58  ;;  %v830_v4 = vshll.u32 %v2311_v51, %v827_v58  ;;  %vm846_vm1 = vcmp.lt.s32.totalorder %v2930_v6, 2 }
  0x98   : > { %vm767_vm2 = vc.u32 %v2928_v31, %v2908_v23  ;;  %v833_v62 = vshll.u32 %v2312_v53, %v827_v58  ;;  %v836_v30 = vshll.u32 %v2313_v55, %v827_v58  ;;  %v839_v42 = vshll.u32 %v2314_v57, %v827_v58 }
  0x99   : > { %v692_v44 = vsel %vm609_vm0, %v691_v56, %v690_v19  ;;  %v769_v34 = vsel %vm767_vm2, %v768_v61, %v2909_v16  ;;  %v831_v38 = vshrl.u32 %v2312_v53, %v828_v21  ;;  %v834_v32 = vshrl.u32 %v2313_v55, %v828_v21 }
  0x9a   : > { %v695_v63 = vsel %vm2861_vm11, %v2501_v40, %v692_v44  ;;  %v770_v17 = vadd.s32 %v769_v34, %v765_v54  ;;  %v837_v18 = vshrl.u32 %v2314_v57, %v828_v21  ;;  %v840_v45 = vshrl.u32 %v2315_v59, %v828_v21 }
  0x9b   : > { %2269 = vcosq.f32 %v695_v63  ;;  %v832_v50 = vor.u32 %v831_v38, %v830_v4  ;;  %v842_v41 = vshll.u32 %v2315_v59, %v827_v58  ;;  %v835_v7 = vor.u32 %v834_v32, %v833_v62 }
  0x9c   : > { %2271 = vsinq.f32 %v695_v63  ;;  %v771_v33 = vadd.s32 536870912, %v770_v17  ;;  %v838_v8 = vor.u32 %v837_v18, %v836_v30  ;;  %v843_v24 = vshrl.u32 %v2316_v10, %v828_v21 }
  0x9d   : > { %v829_v20 = vshrl.u32 %v2311_v51, %v828_v21  ;;  %v841_v14 = vor.u32 %v840_v45, %v839_v42  ;;  %vm847_vm0 = vcmp.lt.s32.totalorder %v2930_v6, 3  ;;  %vm848_vm3 = vcmp.lt.s32.totalorder %v2930_v6, 4 }
  0x9e   : > { %v2959_v15 = vshrl.u32 %v771_v33, 30  ;;  %v844_v2 = vor.u32 %v843_v24, %v842_v41  ;;  %v853_v16 = vsel %vm845_vm15, %v832_v50, %v835_v7  ;;  %v2165_v5 = vadd.s32 4294967169, %v920_v27 }
  0x9f   : > { %v1528_v13 = vand.u32 3, %v1527_v35  ;;  %v854_v39 = vsel %vm848_vm3, %v841_v14, 920167782  ;;  %v861_v25 = vshll.u32 %v821_v52, 8  ;;  %v850_v1 = vsel %vm848_vm3, %v838_v8, 2102212464 }
  0xa0   : > { %v773_v26 = vshll.u32 %v2959_v15, 30  ;;  %v855_v28 = vsel %vm847_vm0, %v838_v8, %v854_v39  ;;  %v857_v3 = vsel %vm845_vm15, %v835_v7, %v838_v8  ;;  %vm701_vm4 = vcmp.lt.s32.totalorder %v2932_v37, 2 }
  0xa1   : > { %vm702_vm5 = vcmp.eq.s32.totalorder %v2932_v37, 0  ;;  %v856_v19 = vsel %vm846_vm1, %v853_v16, %v855_v28  ;;  %v858_v29 = vsel %vm848_vm3, %v844_v2, 1326507024  ;;  %v849_v52 = vsel %vm845_vm15, %v829_v20, %v832_v50  ;;  %v3006_v2 = vld [vmem:[%s2359_s23 + $0x18] sm:$0xff] }
  0xa2   : > { %v2972_v61 = vsub.s32 %v770_v17, %v773_v26  ;;  %v859_v58 = vsel %vm847_vm0, %v841_v14, %v858_v29  ;;  %v926_v56 = vadd.s32 1, %v2165_v5  ;;  %v851_v35 = vsel %vm847_vm0, %v835_v7, %v850_v1  ;;  %v3011_v5 = vld [vmem:[%s2365_s26 + $0x18] sm:$0xff] }
  0xa3   : > { %v860_v54 = vsel %vm846_vm1, %v857_v3, %v859_v58  ;;  %v2982_v27 = vmul.u32.u64.low %v861_v25, %v856_v19  ;;  %v2983_v21 = vmul.u32.u64.high %v861_v25, %v856_v19, %v2982_v27  ;;  %vm705_vm6 = vcmp.eq.s32.totalorder %v2932_v37, 2  ;;  %v3022_v1 = vld [vmem:[%s2359_s23 + $0x38] sm:$0xff] }
  0xa4   : > { %vm1529_vm7 = vcmp.lt.s32.totalorder %v1528_v13, 2  ;;  %vm1533_vm8 = vcmp.eq.s32.totalorder %v1528_v13, 2  ;;  %v776_v44 = vsub.s32 0, %v2972_v61  ;;  %vm1530_vm9 = vcmp.eq.s32.totalorder %v1528_v13, 0 }
  0xa5   : > { %v2270_v4 = vpop.eup %2269  ;;  %v2988_v63 = vmul.u32.u64.low %v861_v25, %v860_v54  ;;  %v2989_v34 = vmul.u32.u64.high %v861_v25, %v860_v54, %v2988_v63  ;;  %v852_v17 = vsel %vm846_vm1, %v849_v52, %v851_v35  ;;  %vm927_vm10 = vcmp.gt.s32.totalorder %v926_v56, 0 }
  0xa6   : > { %v2272_v62 = vpop.eup %2271  ;;  %v706_v30 = vxor.u32 2147483648, %v2270_v4  ;;  %v2158_v42 = vmin.u32 %v776_v44, %v2972_v61  ;;  %vm699_vm11 = vweird.f32 %v2501_v40  ;;  %v871_v33 = vadd.s32 1, %v2983_v21 }
  0xa7   : > { %v703_v38 = vxor.u32 2147483648, %v2272_v62  ;;  %v868_v8 = vmul.u32 %v861_v25, %v852_v17  ;;  %v928_v24 = vsel %vm927_vm10, %v926_v56, 0  ;;  %vm870_vm12 = vc.u32 %v2989_v34, %v2982_v27 }
  0xa8   : > { %v707_v32 = vsel %vm705_vm6, %v706_v30, %v2272_v62  ;;  %v1535_v18 = vsel %vm1533_vm8, %v706_v30, %v2272_v62  ;;  %v778_v41 = vclz %v2158_v42  ;;  %v916_v13 = vand.u32 2147483647, %v2834_v43 }
  0xa9   : > { %v704_v50 = vsel %vm702_vm5, %v2270_v4, %v703_v38  ;;  %v1532_v45 = vsel %vm1530_vm9, %v2270_v4, %v703_v38  ;;  %v766_v39 = vadd.s32 %v2908_v23, %v2928_v31  ;;  %v872_v25 = vsel %vm870_vm12, %v871_v33, %v2983_v21  ;;  %v3047_v38 = vld [vmem:[%s2365_s26 + $0x38] sm:$0xff] }
  0xaa   : > { %v708_v7 = vsel %vm701_vm4, %v704_v50, %v707_v32  ;;  %v1536_v6 = vsel %vm1529_vm7, %v1532_v45, %v1535_v18  ;;  %v2159_v14 = vadd.s32 4294967294, %v778_v41  ;;  %v930_v26 = vand.u32 31, %v928_v24 }
  0xab   : > { %v3001_v20 = vsel %vm699_vm11, nan, %v708_v7  ;;  %v3003_v40 = vsel %vm699_vm11, nan, %v1536_v6  ;;  %v873_v19 = vadd.s32 %v872_v25, %v868_v8  ;;  %vm3026_vm14 = vcmp.le.f32.partialorder %v710_v47, 0.7853982 }
  0xac   : > { %v1957_v16 = vmul.f32 %v3006_v2, %v3001_v20  ;;  %v1965_v37 = vmul.f32 %v3011_v5, %v3003_v40  ;;  %vm2160_vm13 = vcmp.lt.s32.totalorder %v2159_v14, 0  ;;  %v931_v31 = vsub.s32 32, %v930_v26 }
  0xad   : > { %v781_v3 = vsel %vm2160_vm13, 0, %v2159_v14  ;;  %vm712_vm15 = vcmp.lt.s32.totalorder %v2656_v11, 0  ;;  %v874_v56 = vadd.s32 536870912, %v873_v19  ;;  %v923_v35 = vand.u32 8388607, %v916_v13 }
  0xae   : > { %v1973_v28 = vadd.f32 %v1965_v37, %v1957_v16  ;;  %v782_v52 = vsub.s32 32, %v781_v3  ;;  %v783_v58 = vshll.u32 %v2972_v61, %v781_v3  ;;  %v786_v23 = vsub.s32 4294967266, %v781_v3 }
  0xaf   : > { %v3037_v54 = vmul.f32 %v3022_v1, %v3022_v1  ;;  %v796_v4 = vsub.s32 4, %v2959_v15  ;;  %v933_v61 = vshll.u32 %v2311_v51, %v930_v26  ;;  %v3041_v44 = vshrl.u32 %v874_v56, 30 }
  0xb0   : > { %1981 = vst [vmem:[%s2733_s29 + $0x18] sm:$0xff] %v1973_v28  ;;  %v784_v47 = vshrl.u32 %v766_v39, %v782_v52  ;;  %v787_v21 = vadd.s32 127, %v786_v23  ;;  %v934_v62 = vshrl.u32 %v2312_v53, %v931_v31  ;;  %v936_v30 = vshll.u32 %v2312_v53, %v930_v26 }
  0xb1   : > { %v937_v63 = vshrl.u32 %v2313_v55, %v931_v31  ;;  %v942_v32 = vshll.u32 %v2314_v57, %v930_v26  ;;  %v943_v18 = vshrl.u32 %v2315_v59, %v931_v31  ;;  %v876_v50 = vshll.u32 %v3041_v44, 30 }
  0xb2   : > { %v785_v42 = vor.u32 %v784_v47, %v783_v58  ;;  %v788_v17 = vshll.u32 %v787_v21, 23  ;;  %v929_v45 = vshrl.u32 %v928_v24, 5  ;;  %v939_v41 = vshll.u32 %v2313_v55, %v930_v26 }
  0xb3   : > { %v940_v33 = vshrl.u32 %v2314_v57, %v931_v31  ;;  %v797_v8 = vsel %vm712_vm15, %v796_v4, %v2959_v15  ;;  %v280_v14 = vmul.f32 %v3047_v38, %v3047_v38  ;;  %v3059_v16 = vsub.s32 %v873_v19, %v876_v50 }
  0xb4   : > { %v789_v7 = vor.u32 4788187, %v788_v17  ;;  %v792_v6 = vcvt.s32.f32 %v785_v42  ;;  %v924_v37 = vor.u32 8388608, %v923_v35  ;;  %v945_v39 = vshll.u32 %v2315_v59, %v930_v26 }
  0xb5   : > { %v946_v24 = vshrl.u32 %v2316_v10, %v931_v31  ;;  %v935_v28 = vor.u32 %v934_v62, %v933_v61  ;;  %v938_v3 = vor.u32 %v937_v63, %v936_v30  ;;  %v944_v52 = vor.u32 %v943_v18, %v942_v32 }
  0xb6   : > { %v790_v25 = vand.u32 2147483647, %v789_v7  ;;  %v799_v58 = vsel %vm3026_vm14, 0, %v797_v8  ;;  %v879_v23 = vsub.s32 0, %v3059_v16  ;;  %v941_v15 = vor.u32 %v940_v33, %v939_v41 }
  0xb7   : > { %vm948_vm1 = vcmp.lt.s32.totalorder %v929_v45, 1  ;;  %v932_v19 = vshrl.u32 %v2311_v51, %v931_v31  ;;  %vm950_vm2 = vcmp.lt.s32.totalorder %v929_v45, 3  ;;  %vm951_vm0 = vcmp.lt.s32.totalorder %v929_v45, 4 }
  0xb8   : > { %v793_v56 = vmul.f32 %v792_v6, %v790_v25  ;;  %v2162_v26 = vmin.u32 %v879_v23, %v3059_v16  ;;  %v947_v35 = vor.u32 %v946_v24, %v945_v39  ;;  %vm949_vm3 = vcmp.lt.s32.totalorder %v929_v45, 2 }
  0xb9   : > { %v3068_v47 = vshll.u32 %v924_v37, 8  ;;  %v953_v4 = vsel %vm951_vm0, %v941_v15, 2102212464  ;;  %v956_v61 = vsel %vm948_vm1, %v935_v28, %v938_v3  ;;  %v957_v62 = vsel %vm951_vm0, %v944_v52, 920167782 }
  0xba   : > { %v794_v21 = vxor.u32 2147483648, %v793_v56  ;;  %v3073_v30 = vand.u32 3, %v799_v58  ;;  %v1631_v63 = vadd.s32 3, %v799_v58  ;;  %vm815_vm4 = vcmp.lt.s32.totalorder %v2800_v0, 0 }
  0xbb   : > { %v881_v31 = vclz %v2162_v26  ;;  %v958_v42 = vsel %vm950_vm2, %v941_v15, %v957_v62  ;;  %v869_v32 = vadd.s32 %v2982_v27, %v2989_v34  ;;  %v952_v18 = vsel %vm948_vm1, %v932_v19, %v935_v28 }
  0xbc   : > { %v795_v17 = vsel %vm712_vm15, %v794_v21, %v793_v56  ;;  %v954_v50 = vsel %vm950_vm2, %v938_v3, %v953_v4  ;;  %v959_v7 = vsel %vm949_vm3, %v956_v61, %v958_v42  ;;  %v960_v6 = vsel %vm948_vm1, %v938_v3, %v941_v15  ;;  %v2291_v15 = vld [vmem:[%s2365_s26] sm:$0xff]  ;;  %v2294_v42 = vld [vmem:[%s2359_s23 + $0x8] sm:$0xff] }
  0xbd   : > { %v798_v41 = vsel %vm3026_vm14, %v2656_v11, %v795_v17  ;;  %v2163_v33 = vadd.s32 4294967294, %v881_v31  ;;  %vm3090_vm5 = vcmp.le.f32.partialorder %v813_v12, 0.7853982  ;;  %v961_v27 = vsel %vm951_vm0, %v947_v35, 1326507024  ;;  %v2292_v35 = vld [vmem:[%s2359_s23] sm:$0xff] }
  0xbe   : > { %2273 = vcosq.f32 %v798_v41  ;;  %v3096_v34 = vmul.u32.u64.low %v3068_v47, %v959_v7  ;;  %v3097_v37 = vmul.u32.u64.high %v3068_v47, %v959_v7, %v3096_v34  ;;  %v899_v29 = vsub.s32 4, %v3041_v44 }
  0xbf   : > { %2275 = vsinq.f32 %v798_v41  ;;  %vm2164_vm6 = vcmp.lt.s32.totalorder %v2163_v33, 0  ;;  %v962_v39 = vsel %vm950_vm2, %v944_v52, %v961_v27  ;;  %v955_v25 = vsel %vm949_vm3, %v952_v18, %v954_v50 }
  0xc0   : > { %v884_v24 = vsel %vm2164_vm6, 0, %v2163_v33  ;;  %v963_v12 = vsel %vm949_vm3, %v960_v6, %v962_v39  ;;  %v288_v28 = vadd.f32 %v280_v14, %v3037_v54  ;;  %vm805_vm7 = vcmp.eq.s32.totalorder %v3073_v30, 0 }
  0xc1   : > { %v885_v3 = vsub.s32 32, %v884_v24  ;;  %v886_v58 = vshll.u32 %v3059_v16, %v884_v24  ;;  %v889_v23 = vsub.s32 4294967266, %v884_v24  ;;  %v1986_v56 = vmul.f32 %v2291_v15, %v2715_v60 }
  0xc2   : > { %vm804_vm8 = vcmp.lt.s32.totalorder %v3073_v30, 2  ;;  %v1632_v52 = vand.u32 3, %v1631_v63  ;;  %v3111_v45 = vmul.u32.u64.low %v3068_v47, %v963_v12  ;;  %v3112_v19 = vmul.u32.u64.high %v3068_v47, %v963_v12, %v3111_v45 }
  0xc3   : > { %v3115_v54 = vmul.f32 %v2391_v9, %v288_v28  ;;  %vm802_vm9 = vweird.f32 %v2656_v11  ;;  %v887_v14 = vshrl.u32 %v869_v32, %v885_v3  ;;  %v890_v16 = vadd.s32 127, %v889_v23  ;;  %v2293_v9 = vld [vmem:[%s2365_s26 + $0x8] sm:$0xff] }
  0xc4   : > { %v974_v26 = vadd.s32 1, %v3097_v37  ;;  %v1994_v60 = vmul.f32 %v2292_v35, %v2719_v46  ;;  %v900_v21 = vsel %vm815_vm4, %v899_v29, %v3041_v44  ;;  %v971_v4 = vmul.u32 %v3068_v47, %v955_v25 }
  0xc5   : > { %v1022_v61 = vand.u32 2139095040, %v3115_v54  ;;  %v1987_v62 = vmul.f32 %v2293_v9, %v2771_v48  ;;  %v888_v63 = vor.u32 %v887_v14, %v886_v58  ;;  %v891_v31 = vshll.u32 %v890_v16, 23 }
  0xc6   : > { %v2002_v46 = vsub.f32 %v1986_v56, %v1994_v60  ;;  %v1995_v17 = vmul.f32 %v2294_v42, %v2775_v49  ;;  %vm808_vm10 = vcmp.eq.s32.totalorder %v3073_v30, 2  ;;  %vm1633_vm11 = vcmp.lt.s32.totalorder %v1632_v52, 2 }
  0xc7   : > { %vm973_vm12 = vc.u32 %v3112_v19, %v3096_v34  ;;  %v1023_v44 = vshrl.u32 %v1022_v61, 23  ;;  %v892_v47 = vor.u32 4788187, %v891_v31  ;;  %v895_v32 = vcvt.s32.f32 %v888_v63  ;;  %v3168_v61 = vld [vmem:[%s2359_s23 + $0x20] sm:$0xff] }
  0xc8   : > { %v902_v18 = vsel %vm3090_vm5, 0, %v900_v21  ;;  %v975_v48 = vsel %vm973_vm12, %v974_v26, %v3097_v37  ;;  %2010 = vst [vmem:[%s3130_s6] sm:$0xff] %v2002_v46  ;;  %v2274_v50 = vpop.eup %2273  ;;  %vm1637_vm13 = vcmp.eq.s32.totalorder %v1632_v52, 2  ;;  %v2003_v33 = vsub.f32 %v1987_v62, %v1995_v17 }
  0xc9   : > { %v976_v41 = vadd.s32 %v975_v48, %v971_v4  ;;  %v2169_v49 = vadd.s32 4294967169, %v1023_v44  ;;  %v2276_v7 = vpop.eup %2275  ;;  %v809_v6 = vxor.u32 2147483648, %v2274_v50  ;;  %vm1634_vm14 = vcmp.eq.s32.totalorder %v1632_v52, 0  ;;  %v3173_v52 = vld [vmem:[%s2365_s26 + $0x20] sm:$0xff] }
  0xca   : > { %v893_v27 = vand.u32 2147483647, %v892_v47  ;;  %v3143_v29 = vand.u32 3, %v902_v18  ;;  %v806_v39 = vxor.u32 2147483648, %v2276_v7  ;;  %v1735_v24 = vadd.s32 3, %v902_v18  ;;  %2011 = vst [vmem:[%s3130_s6 + $0x8] sm:$0xff] %v2003_v33 }
  0xcb   : > { %v977_v25 = vadd.s32 536870912, %v976_v41  ;;  %v1029_v12 = vadd.s32 1, %v2169_v49  ;;  %v810_v37 = vsel %vm808_vm10, %v809_v6, %v2276_v7  ;;  %v1639_v28 = vsel %vm1637_vm13, %v809_v6, %v2276_v7  ;;  %v2297_v18 = vld [vmem:[%s2365_s26 + $0x10] sm:$0xff] }
  0xcc   : > { %v896_v3 = vmul.f32 %v895_v32, %v893_v27  ;;  %v1019_v58 = vand.u32 2147483647, %v3115_v54  ;;  %v807_v23 = vsel %vm805_vm7, %v2274_v50, %v806_v39  ;;  %v1636_v15 = vsel %vm1634_vm14, %v2274_v50, %v806_v39 }
  0xcd   : > { %v3151_v56 = vshrl.u32 %v977_v25, 30  ;;  %vm1030_vm15 = vcmp.gt.s32.totalorder %v1029_v12, 0  ;;  %v811_v45 = vsel %vm804_vm8, %v807_v23, %v810_v37  ;;  %v1640_v14 = vsel %vm1633_vm11, %v1636_v15, %v1639_v28 }
  0xce   : > { %v897_v16 = vxor.u32 2147483648, %v896_v3  ;;  %v1031_v26 = vsel %vm1030_vm15, %v1029_v12, 0  ;;  %v3158_v35 = vsel %vm802_vm9, nan, %v811_v45  ;;  %v3162_v60 = vsel %vm802_vm9, nan, %v1640_v14 }
  0xcf   : > { %v3164_v21 = vand.u32 3, %v1735_v24  ;;  %v979_v4 = vshll.u32 %v3151_v56, 30  ;;  %v1958_v30 = vmul.f32 %v3168_v61, %v3158_v35  ;;  %v1966_v9 = vmul.f32 %v3173_v52, %v3162_v60 }
  0xd0   : > { %v898_v11 = vsel %vm815_vm4, %v897_v16, %v896_v3  ;;  %v1026_v62 = vand.u32 8388607, %v1019_v58  ;;  %v1033_v46 = vand.u32 31, %v1031_v26  ;;  %v972_v17 = vadd.s32 %v3096_v34, %v3112_v19 }
  0xd1   : > { %v901_v63 = vsel %vm3090_vm5, %v2800_v0, %v898_v11  ;;  %v3184_v31 = vsub.s32 %v976_v41, %v979_v4  ;;  %v1974_v42 = vadd.f32 %v1966_v9, %v1958_v30  ;;  %vm911_vm1 = vcmp.eq.s32.totalorder %v3143_v29, 2  ;;  %v2298_v41 = vld [vmem:[%s2359_s23 + $0x10] sm:$0xff] }
  0xd2   : > { %2277 = vcosq.f32 %v901_v63  ;;  %vm1741_vm2 = vcmp.eq.s32.totalorder %v3164_v21, 2  ;;  %v1027_v47 = vor.u32 8388608, %v1026_v62  ;;  %v1034_v8 = vsub.s32 32, %v1033_v46 }
  0xd3   : > { %2279 = vsinq.f32 %v901_v63  ;;  %v982_v44 = vsub.s32 0, %v3184_v31  ;;  %1982 = vst [vmem:[%s2733_s29 + $0x20] sm:$0xff] %v1974_v42  ;;  %v1036_v32 = vshll.u32 %v2311_v51, %v1033_v46  ;;  %v3195_v48 = vmul.f32 %v2297_v18, %v2877_v36 }
  0xd4   : > { %vm908_vm0 = vcmp.eq.s32.totalorder %v3143_v29, 0  ;;  %vm1738_vm3 = vcmp.eq.s32.totalorder %v3164_v21, 0  ;;  %v3200_v19 = vshrl.u32 %v1031_v26, 5  ;;  %v1039_v50 = vshll.u32 %v2312_v53, %v1033_v46 }
  0xd5   : > { %v2166_v34 = vmin.u32 %v982_v44, %v3184_v31  ;;  %v3205_v49 = vmul.f32 %v2298_v41, %v2881_v22  ;;  %vm907_vm4 = vcmp.lt.s32.totalorder %v3143_v29, 2  ;;  %vm1737_vm5 = vcmp.lt.s32.totalorder %v3164_v21, 2  ;;  %v2299_v29 = vld [vmem:[%s2359_s23 + $0x28] sm:$0xff] }
  0xd6   : > { %v1035_v36 = vshrl.u32 %v2311_v51, %v1034_v8  ;;  %v1037_v33 = vshrl.u32 %v2312_v53, %v1034_v8  ;;  %v1040_v7 = vshrl.u32 %v2313_v55, %v1034_v8  ;;  %v1042_v6 = vshll.u32 %v2313_v55, %v1033_v46  ;;  %v2300_v21 = vld [vmem:[%s2365_s26 + $0x28] sm:$0xff] }
  0xd7   : > { %vm905_vm6 = vweird.f32 %v2800_v0  ;;  %v984_v27 = vclz %v2166_v34  ;;  %v1043_v39 = vshrl.u32 %v2314_v57, %v1034_v8  ;;  %v1045_v22 = vshll.u32 %v2314_v57, %v1033_v46 }
  0xd8   : > { %v1046_v24 = vshrl.u32 %v2315_v59, %v1034_v8  ;;  %v1002_v25 = vsub.s32 4, %v3151_v56  ;;  %v1038_v12 = vor.u32 %v1037_v33, %v1036_v32  ;;  %v3218_v37 = vshll.u32 %v1027_v47, 8 }
  0xd9   : > { %v3222_v51 = vmul.f32 %v3011_v5, %v3001_v20  ;;  %v2167_v53 = vadd.s32 4294967294, %v984_v27  ;;  %v1041_v55 = vor.u32 %v1040_v7, %v1039_v50  ;;  %vm1051_vm7 = vcmp.lt.s32.totalorder %v3200_v19, 1 }
  0xda   : > { %v1047_v28 = vor.u32 %v1046_v24, %v1045_v22  ;;  %v1044_v3 = vor.u32 %v1043_v39, %v1042_v6  ;;  %v1048_v23 = vshll.u32 %v2315_v59, %v1033_v46  ;;  %v1049_v57 = vshrl.u32 %v2316_v10, %v1034_v8 }
  0xdb   : > { %vm1052_vm8 = vcmp.lt.s32.totalorder %v3200_v19, 2  ;;  %vm2168_vm9 = vcmp.lt.s32.totalorder %v2167_v53, 0  ;;  %vm1053_vm10 = vcmp.lt.s32.totalorder %v3200_v19, 3  ;;  %vm1054_vm11 = vcmp.lt.s32.totalorder %v3200_v19, 4 }
  0xdc   : > { %v1055_v20 = vsel %vm1051_vm7, %v1035_v36, %v1038_v12  ;;  %v2278_v5 = vpop.eup %2277  ;;  %v987_v15 = vsel %vm2168_vm9, 0, %v2167_v53  ;;  %v1056_v45 = vsel %vm1054_vm11, %v1044_v3, 2102212464  ;;  %v1059_v59 = vsel %vm1051_vm7, %v1038_v12, %v1041_v55 }
  0xdd   : > { %v1060_v10 = vsel %vm1054_vm11, %v1047_v28, 920167782  ;;  %v2280_v14 = vpop.eup %2279  ;;  %v912_v16 = vxor.u32 2147483648, %v2278_v5  ;;  %v988_v26 = vsub.s32 32, %v987_v15  ;;  %v989_v4 = vshll.u32 %v3184_v31, %v987_v15 }
  0xde   : > { %v992_v30 = vsub.s32 4294967266, %v987_v15  ;;  %v909_v9 = vxor.u32 2147483648, %v2280_v14  ;;  %v1050_v11 = vor.u32 %v1049_v57, %v1048_v23  ;;  %v1057_v62 = vsel %vm1053_vm10, %v1041_v55, %v1056_v45 }
  0xdf   : > { %v1061_v63 = vsel %vm1053_vm10, %v1044_v3, %v1060_v10  ;;  %v913_v46 = vsel %vm911_vm1, %v912_v16, %v2280_v14  ;;  %v1743_v42 = vsel %vm1741_vm2, %v912_v16, %v2280_v14  ;;  %v990_v44 = vshrl.u32 %v972_v17, %v988_v26 }
  0xe0   : > { %v993_v47 = vadd.s32 127, %v992_v30  ;;  %v910_v31 = vsel %vm908_vm0, %v2278_v5, %v909_v9  ;;  %v1740_v8 = vsel %vm1738_vm3, %v2278_v5, %v909_v9  ;;  %v1062_v32 = vsel %vm1052_vm8, %v1059_v59, %v1061_v63 }
  0xe1   : > { %v1063_v18 = vsel %vm1051_vm7, %v1041_v55, %v1044_v3  ;;  %v914_v34 = vsel %vm907_vm4, %v910_v31, %v913_v46  ;;  %v1744_v17 = vsel %vm1737_vm5, %v1740_v8, %v1743_v42  ;;  %v991_v50 = vor.u32 %v990_v44, %v989_v4 }
  0xe2   : > { %v994_v41 = vshll.u32 %v993_v47, 23  ;;  %v915_v36 = vsel %vm905_vm6, nan, %v914_v34  ;;  %v1745_v33 = vsel %vm905_vm6, nan, %v1744_v17  ;;  %v1058_v7 = vsel %vm1052_vm8, %v1055_v20, %v1057_v62 }
  0xe3   : > { %v1064_v6 = vsel %vm1054_vm11, %v1050_v11, 1326507024  ;;  %v1959_v27 = vmul.f32 %v2299_v29, %v915_v36  ;;  %v1967_v39 = vmul.f32 %v2300_v21, %v1745_v33  ;;  %v998_v24 = vcvt.s32.f32 %v991_v50 }
  0xe4   : > { %v995_v22 = vor.u32 4788187, %v994_v41  ;;  %v1065_v12 = vsel %vm1053_vm10, %v1047_v28, %v1064_v6  ;;  %v3272_v0 = vmul.u32.u64.low %v3218_v37, %v1062_v32  ;;  %v3273_v53 = vmul.u32.u64.high %v3218_v37, %v1062_v32, %v3272_v0 }
  0xe5   : > { %v2004_v55 = vsub.f32 %v3195_v48, %v3205_v49  ;;  %v1975_v3 = vadd.f32 %v1967_v39, %v1959_v27  ;;  %v1066_v57 = vsel %vm1052_vm8, %v1063_v18, %v1065_v12  ;;  %v1997_v20 = vmul.f32 %v3006_v2, %v3003_v40 }
  0xe6   : > { %v996_v23 = vand.u32 2147483647, %v995_v22  ;;  %v3283_v5 = vmul.u32.u64.low %v3218_v37, %v1066_v57  ;;  %v3284_v15 = vmul.u32.u64.high %v3218_v37, %v1066_v57, %v3283_v5  ;;  %v1990_v28 = vmul.f32 %v3173_v52, %v3158_v35 }
  0xe7   : > { %2012 = vst [vmem:[%s3130_s6 + $0x10] sm:$0xff] %v2004_v55  ;;  %v1998_v48 = vmul.f32 %v3168_v61, %v3162_v60  ;;  %1983 = vst [vmem:[%s2733_s29 + $0x28] sm:$0xff] %v1975_v3  ;;  %v2005_v19 = vsub.f32 %v3222_v51, %v1997_v20  ;;  %v1991_v45 = vmul.f32 %v2300_v21, %v915_v36  ;;  %vm918_vm12 = vcmp.lt.s32.totalorder %v2834_v43, 0 }
  0xe8   : > { %v999_v49 = vmul.f32 %v998_v24, %v996_v23  ;;  %v1999_v40 = vmul.f32 %v2299_v29, %v1745_v33  ;;  %v1074_v2 = vmul.u32 %v3218_v37, %v1058_v7  ;;  %v1077_v59 = vadd.s32 1, %v3273_v53  ;;  %v2301_v7 = vld [vmem:[%s2359_s23 + $0x30] sm:$0xff] }
  0xe9   : > { %v2006_v10 = vsub.f32 %v1990_v28, %v1998_v48  ;;  %vm917_vm13 = vcmp.le.f32.partialorder %v916_v13, 0.7853982  ;;  %v1003_v60 = vsel %vm918_vm12, %v1002_v25, %v3151_v56  ;;  %2013 = vst [vmem:[%s3130_s6 + $0x18] sm:$0xff] %v2005_v19  ;;  %vm1076_vm14 = vc.u32 %v3284_v15, %v3272_v0  ;;  %v2302_v29 = vld [vmem:[%s2365_s26 + $0x30] sm:$0xff] }
  0xea   : > { %v1000_v35 = vxor.u32 2147483648, %v999_v49  ;;  %v2007_v61 = vsub.f32 %v1991_v45, %v1999_v40  ;;  %v1078_v37 = vsel %vm1076_vm14, %v1077_v59, %v3273_v53  ;;  %v1005_v14 = vsel %vm917_vm13, 0, %v1003_v60 }
  0xeb   : > { %2014 = vst [vmem:[%s3130_s6 + $0x20] sm:$0xff] %v2006_v10  ;;  %v1079_v16 = vadd.s32 %v1078_v37, %v1074_v2  ;;  %v1839_v26 = vadd.s32 3, %v1005_v14  ;;  %v1009_v25 = vand.u32 3, %v1005_v14  ;;  %vm1008_vm5 = vweird.f32 %v2834_v43 }
  0xec   : > { %v1001_v52 = vsel %vm918_vm12, %v1000_v35, %v999_v49  ;;  %2015 = vst [vmem:[%s3130_s6 + $0x28] sm:$0xff] %v2007_v61  ;;  %v1075_v33 = vadd.s32 %v3272_v0, %v3284_v15  ;;  %vm1021_vm7 = vcmp.lt.s32.totalorder %v3115_v54, 0  ;;  %vm1020_vm8 = vcmp.le.f32.partialorder %v1019_v58, 0.7853982 }
  0xed   : > { %v1004_v51 = vsel %vm917_vm13, %v2834_v43, %v1001_v52  ;;  %v1080_v13 = vadd.s32 536870912, %v1079_v16  ;;  %v1840_v30 = vand.u32 3, %v1839_v26  ;;  %vm1014_vm15 = vcmp.eq.s32.totalorder %v1009_v25, 2 }
  0xee   : > { %2281 = vcosq.f32 %v1004_v51  ;;  %vm1011_vm2 = vcmp.eq.s32.totalorder %v1009_v25, 0  ;;  %vm1010_vm3 = vcmp.lt.s32.totalorder %v1009_v25, 2 }
  0xef   : > { %2283 = vsinq.f32 %v1004_v51  ;;  %v1081_v4 = vshrl.u32 %v1080_v13, 30  ;;  %vm1845_vm1 = vcmp.eq.s32.totalorder %v1840_v30, 2  ;;  %vm1842_vm0 = vcmp.eq.s32.totalorder %v1840_v30, 0 }
  0xf0   : > { %vm1841_vm4 = vcmp.lt.s32.totalorder %v1840_v30, 2 }
  0xf1   : > { %v1082_v56 = vshll.u32 %v1081_v4, 30  ;;  %v1105_v28 = vsub.s32 4, %v1081_v4 }
  0xf3   : > { %v1083_v9 = vsub.s32 %v1079_v16, %v1082_v56  ;;  %v1106_v19 = vsel %vm1021_vm7, %v1105_v28, %v1081_v4 }
  0xf4   : > { %v1108_v2 = vsel %vm1020_vm8, 0, %v1106_v19 }
  0xf5   : > { %v1085_v11 = vsub.s32 0, %v1083_v9  ;;  %v1943_v59 = vadd.s32 3, %v1108_v2  ;;  %v1112_v10 = vand.u32 3, %v1108_v2 }
  0xf7   : > { %v2170_v42 = vmin.u32 %v1085_v11, %v1083_v9  ;;  %v1944_v35 = vand.u32 3, %v1943_v59  ;;  %vm1117_vm9 = vcmp.eq.s32.totalorder %v1112_v10, 2  ;;  %vm1114_vm11 = vcmp.eq.s32.totalorder %v1112_v10, 0 }
  0xf8   : > { %v2282_v62 = vpop.eup %2281  ;;  %vm1113_vm13 = vcmp.lt.s32.totalorder %v1112_v10, 2 }
  0xf9   : > { %v2284_v63 = vpop.eup %2283  ;;  %v1015_v46 = vxor.u32 2147483648, %v2282_v62  ;;  %v1087_v8 = vclz %v2170_v42  ;;  %vm1949_vm10 = vcmp.eq.s32.totalorder %v1944_v35, 2  ;;  %vm1946_vm12 = vcmp.eq.s32.totalorder %v1944_v35, 0 }
  0xfa   : > { %v1012_v44 = vxor.u32 2147483648, %v2284_v63  ;;  %vm1945_vm14 = vcmp.lt.s32.totalorder %v1944_v35, 2 }
  0xfb   : > { %v1016_v47 = vsel %vm1014_vm15, %v1015_v46, %v2284_v63  ;;  %v1847_v31 = vsel %vm1845_vm1, %v1015_v46, %v2284_v63  ;;  %v2171_v50 = vadd.s32 4294967294, %v1087_v8  ;;  %vm1111_vm15 = vweird.f32 %v3115_v54 }
  0xfc   : > { %v1013_v32 = vsel %vm1011_vm2, %v2282_v62, %v1012_v44  ;;  %v1844_v18 = vsel %vm1842_vm0, %v2282_v62, %v1012_v44 }
  0xfd   : > { %v1017_v34 = vsel %vm1010_vm3, %v1013_v32, %v1016_v47  ;;  %v1848_v17 = vsel %vm1841_vm4, %v1844_v18, %v1847_v31  ;;  %vm2172_vm6 = vcmp.lt.s32.totalorder %v2171_v50, 0 }
  0xfe   : > { %v1018_v41 = vsel %vm1008_vm5, nan, %v1017_v34  ;;  %v1849_v36 = vsel %vm1008_vm5, nan, %v1848_v17  ;;  %v1090_v21 = vsel %vm2172_vm6, 0, %v2171_v50 }
  0xff   : > { %v1960_v6 = vmul.f32 %v2301_v7, %v1018_v41  ;;  %v1968_v27 = vmul.f32 %v2302_v29, %v1849_v36  ;;  %v1992_v43 = vmul.f32 %v2302_v29, %v1018_v41  ;;  %v2000_v39 = vmul.f32 %v2301_v7, %v1849_v36 }
 0x100   : > { %v1091_v24 = vsub.s32 32, %v1090_v21  ;;  %v1092_v12 = vshll.u32 %v1083_v9, %v1090_v21  ;;  %v1095_v53 = vsub.s32 4294967266, %v1090_v21 }
 0x101   : > { %v1976_v22 = vadd.f32 %v1968_v27, %v1960_v6  ;;  %v2008_v55 = vsub.f32 %v1992_v43, %v2000_v39 }
 0x102   : > { %v1093_v3 = vshrl.u32 %v1075_v33, %v1091_v24  ;;  %v1096_v23 = vadd.s32 127, %v1095_v53 }
 0x103   : > { %1984 = vst [vmem:[%s2733_s29 + $0x30] sm:$0xff] %v1976_v22  ;;  %2016 = vst [vmem:[%s3130_s6 + $0x30] sm:$0xff] %v2008_v55 }
 0x104   : > { %v1094_v57 = vor.u32 %v1093_v3, %v1092_v12  ;;  %v1097_v0 = vshll.u32 %v1096_v23, 23 }
 0x106   : > { %v1098_v20 = vor.u32 4788187, %v1097_v0  ;;  %v1101_v5 = vcvt.s32.f32 %v1094_v57 }
 0x108   : > { %v1099_v15 = vand.u32 2147483647, %v1098_v20 }
 0x10a   : > { %v1102_v48 = vmul.f32 %v1101_v5, %v1099_v15 }
 0x10c   : > { %v1103_v49 = vxor.u32 2147483648, %v1102_v48 }
 0x10e   : > { %v1104_v45 = vsel %vm1021_vm7, %v1103_v49, %v1102_v48 }
 0x10f   : > { %v1107_v40 = vsel %vm1020_vm8, %v3115_v54, %v1104_v45 }
 0x110   : > { %2285 = vcosq.f32 %v1107_v40 }
 0x111   : > { %2287 = vsinq.f32 %v1107_v40 }
 0x11a   : > { %v2286_v60 = vpop.eup %2285 }
 0x11b   : > { %v2288_v61 = vpop.eup %2287  ;;  %v1118_v52 = vxor.u32 2147483648, %v2286_v60 }
 0x11c   : > { %v1115_v58 = vxor.u32 2147483648, %v2288_v61 }
 0x11d   : > { %v1119_v37 = vsel %vm1117_vm9, %v1118_v52, %v2288_v61  ;;  %v1951_v51 = vsel %vm1949_vm10, %v1118_v52, %v2288_v61 }
 0x11e   : > { %v1116_v14 = vsel %vm1114_vm11, %v2286_v60, %v1115_v58  ;;  %v1948_v16 = vsel %vm1946_vm12, %v2286_v60, %v1115_v58 }
 0x11f   : > { %v1120_v13 = vsel %vm1113_vm13, %v1116_v14, %v1119_v37  ;;  %v1952_v26 = vsel %vm1945_vm14, %v1948_v16, %v1951_v51 }
 0x120   : > { %v1121_v4 = vsel %vm1111_vm15, nan, %v1120_v13  ;;  %v1953_v56 = vsel %vm1111_vm15, nan, %v1952_v26 }
 0x121   : > { %v1961_v25 = vmul.f32 %v1121_v4, %v3022_v1  ;;  %v1969_v30 = vmul.f32 %v1953_v56, %v3047_v38  ;;  %v1993_v9 = vmul.f32 %v1121_v4, %v3047_v38  ;;  %v2001_v11 = vmul.f32 %v1953_v56, %v3022_v1 }
 0x123   : > { %v1977_v62 = vadd.f32 %v1969_v30, %v1961_v25  ;;  %v2009_v63 = vsub.f32 %v1993_v9, %v2001_v11 }
 0x125   : > { %1985 = vst [vmem:[%s2733_s29 + $0x38] sm:$0xff] %v1977_v62  ;;  %2017 = vst [vmem:[%s3130_s6 + $0x38] sm:$0xff] %v2009_v63 }
 0x126 PF: > { %s16_s17 = sadd.s32 1, %s2309_s17  }
 0x127   : > { %p13_p4 = scmp.ge.s32.totalorder %s16_s17, 10  }
 0x129   :  { %15 = sbr.rel (!%p13_p4) target bundleno = 2 (0x2), region = 77 }

</bundles_post_ra>
